<compile_context>
chip_gen: v7x
topology: tpu7x:2x2x1
jax: 0.10.0
libtpu: 0.0.40
codegen_flags: <defaults>
</compile_context>

<pallas_src>
import math
import functools

import jax
import jax.numpy as jnp
from jax.experimental import pallas as pl
from jax.experimental.pallas import tpu as pltpu


# ---------------------------------------------------------------- helpers ---

def _layer_norm(x, w, b, eps=1e-5):
    mu = jnp.mean(x, axis=-1, keepdims=True)
    var = jnp.mean((x - mu) ** 2, axis=-1, keepdims=True)
    return (x - mu) * jax.lax.rsqrt(var + eps) * w + b


_SQRT_2_OVER_PI = 0.7978845608028654


def _gelu_tanh(x):
    # tanh-form GELU: the tanh runs on the EUP slot instead of a ~12-op VALU
    # erf polynomial on the largest (S, F) tensor in the block.
    return 0.5 * x * (1.0 + jnp.tanh(_SQRT_2_OVER_PI * (x + 0.044715 * x * x * x)))


def _gelu_erf(x):
    return 0.5 * x * (1.0 + jax.lax.erf(x * (1.0 / math.sqrt(2.0))))


# ------------------------------------------------- transformer block stack --

def gpt_blocks_kernel(x_ref, tok_ref,
                      ln1w_ref, ln1b_ref, wq_ref, wk_ref, wv_ref, wo_ref,
                      ln2w_ref, ln2b_ref, w1_ref, w2_ref,
                      h_out_ref, h_scr, *, n_head):
    """One grid step = one transformer layer of one batch row.

    grid = (B, L); the hidden state is carried across the inner ("arbitrary")
    layer axis in a VMEM scratch so the whole stack runs in a single
    pallas_call and layer l+1's bf16 weights are DMA-prefetched (double
    buffered) while layer l computes.
    """
    l = pl.program_id(1)
    n_layers = pl.num_programs(1)
    bf16 = jnp.bfloat16

    @pl.when(l == 0)
    def _():
        h_scr[...] = x_ref[0]          # initial hidden = tok_emb + pos_emb

    x = h_scr[...]                     # (S, D) f32 hidden state (layer carry)
    tok = tok_ref[0]                   # (S, D) f32 raw token embeddings
    S, D = x.shape
    hd = D // n_head
    scale = 1.0 / math.sqrt(hd)

    # ---- attention ------------------------------------------------------
    hn = _layer_norm(x, ln1w_ref[0], ln1b_ref[0]).astype(bf16)

    # Full-width projections (K = D).  Scale folded into q once: O(S*D) work
    # instead of O(S^2 * H) multiplies on the score matrices.
    q = jnp.dot(hn, wq_ref[0], preferred_element_type=jnp.float32) * scale
    k = jnp.dot(hn, wk_ref[0], preferred_element_type=jnp.float32)
    v = jnp.dot(tok.astype(bf16), wv_ref[0], preferred_element_type=jnp.float32)

    # One relayout to head-major (H, S, hd) replaces n_head lane-offset slices
    # and per-head transposes.
    qh = q.reshape(S, n_head, hd).transpose(1, 0, 2).astype(bf16)
    kh = k.reshape(S, n_head, hd).transpose(1, 0, 2).astype(bf16)
    vh = v.reshape(S, n_head, hd).transpose(1, 0, 2).astype(bf16)

    # Batched QK^T for all heads, contracting the trailing head_dim directly
    # (no explicit k.T / XLU transpose).
    scores = jnp.einsum('hqc,hkc->hqk', qh, kh,
                        preferred_element_type=jnp.float32)
    row = jax.lax.broadcasted_iota(jnp.int32, (S, S), 0)
    col = jax.lax.broadcasted_iota(jnp.int32, (S, S), 1)
    scores = jnp.where((col <= row)[None], scores, -jnp.inf)

    m = jnp.max(scores, axis=-1, keepdims=True)
    e = jnp.exp(scores - m)
    # exact reciprocal keeps bit-level parity with the pure-JAX mirror check;
    # approx=True would move the divide onto the otherwise-idle EUP slot.
    p = e * pl.reciprocal(jnp.sum(e, axis=-1, keepdims=True), approx=False)

    attn = jnp.einsum('hqk,hkc->hqc', p.astype(bf16), vh,
                      preferred_element_type=jnp.float32)
    attn = attn.transpose(1, 0, 2).reshape(S, D)
    # ONE (S, D) @ (D, D) output projection (K = D) instead of n_head K=hd
    # matmuls.
    attn_proj = jnp.dot(attn.astype(bf16), wo_ref[0],
                        preferred_element_type=jnp.float32)

    # TODO(synk): attn/resid/out/ffn dropout layers are identity (eval mode).
    x = x + attn_proj

    # ---- feed-forward ---------------------------------------------------
    # TODO(synk): for large F the MLP would get an extra F-tile grid axis; at
    # these sizes the whole per-layer weight slab fits in VMEM comfortably.
    hn2 = _layer_norm(x, ln2w_ref[0], ln2b_ref[0]).astype(bf16)
    f1 = jnp.dot(hn2, w1_ref[0], preferred_element_type=jnp.float32)
    g = _gelu_tanh(f1).astype(bf16)
    ffn = jnp.dot(g, w2_ref[0], preferred_element_type=jnp.float32)

    h_new = x + ffn
    h_scr[...] = h_new

    @pl.when(l == n_layers - 1)
    def _():
        h_out_ref[0] = h_new


def run_blocks(h0, tok_emb, params, n_head):
    B, S, D = h0.shape
    L = params['wq'].shape[0]
    F = params['w1'].shape[2]
    kernel = functools.partial(gpt_blocks_kernel, n_head=n_head)

    act_spec = pl.BlockSpec((1, S, D), lambda b, l: (b, 0, 0))

    def w_spec(*shape):                 # per-layer weight slab, indexed by l
        return pl.BlockSpec((1,) + shape, lambda b, l: (l, 0, 0))

    return pl.pallas_call(
        kernel,
        out_shape=jax.ShapeDtypeStruct((B, S, D), jnp.float32),
        grid=(B, L),
        in_specs=[act_spec, act_spec,
                  w_spec(1, D), w_spec(1, D),
                  w_spec(D, D), w_spec(D, D), w_spec(D, D), w_spec(D, D),
                  w_spec(1, D), w_spec(1, D),
                  w_spec(D, F), w_spec(F, D)],
        out_specs=act_spec,
        scratch_shapes=[pltpu.VMEM((S, D), jnp.float32)],
        compiler_params=pltpu.CompilerParams(
            # batch axis can be split across TensorCores (v7x megacore); the
            # layer axis is the sequential carry that streams bf16 weights.
            dimension_semantics=("parallel", "arbitrary")),
    )(h0, tok_emb,
      params['ln1w'], params['ln1b'],
      params['wq'], params['wk'], params['wv'], params['wo'],
      params['ln2w'], params['ln2b'], params['w1'], params['w2'])


# ------------------------------------------------ final LN + tied logits ----

def final_kernel(h_ref, lnw_ref, lnb_ref, embT_ref, o_ref):
    hn = _layer_norm(h_ref[...], lnw_ref[...], lnb_ref[...]).astype(jnp.bfloat16)
    o_ref[...] = jnp.dot(hn, embT_ref[...], preferred_element_type=jnp.float32)


def _tile(n, preferred):
    # use the preferred (lane-dense, >=128) tile when it divides n, else the
    # full extent (always legal: block dim == array dim).
    return preferred if (n % preferred == 0) else n


def run_final(h_flat, lnw, lnb, emb_t, tm=256, tn=512):
    BS, D = h_flat.shape
    V = emb_t.shape[1]
    TM, TN = _tile(BS, tm), _tile(V, tn)
    return pl.pallas_call(
        final_kernel,
        out_shape=jax.ShapeDtypeStruct((BS, V), jnp.float32),
        grid=(BS // TM, V // TN),
        in_specs=[pl.BlockSpec((TM, D), lambda i, j: (i, 0)),
                  pl.BlockSpec((1, D), lambda i, j: (0, 0)),
                  pl.BlockSpec((1, D), lambda i, j: (0, 0)),
                  pl.BlockSpec((D, TN), lambda i, j: (0, j))],
        out_specs=pl.BlockSpec((TM, TN), lambda i, j: (i, j)),
        compiler_params=pltpu.CompilerParams(
            dimension_semantics=("parallel", "parallel")),
    )(h_flat, lnw, lnb, emb_t)


# ------------------------------------------------------------- full model ---

def gpt_forward_pallas(tokens, params, n_head):
    B, S = tokens.shape
    V, D = params['emb'].shape
    tok_emb = params['emb'][tokens]                 # gather: plain-JAX glue
    h0 = tok_emb + params['pos'][:S][None]
    h = run_blocks(h0, tok_emb, params, n_head)
    logits = run_final(h.reshape(B * S, D),
                       params['lnfw'], params['lnfb'], params['emb_T'])
    return logits.reshape(B, S, V)


# ------------------------------------------------------- pure-JAX reference -

def gpt_forward_ref(tokens, params, n_head, mimic_kernel=False):
    """Pure-JAX reference.

    mimic_kernel=True mirrors the kernels' mixed precision exactly (bf16 MXU
    operands, f32 accumulation, tanh-GELU) -> tight parity check.
    mimic_kernel=False is the faithful f32 / exact-erf forward of the original
    PyTorch module (up to the bf16 rounding of the stored weights).
    """
    if mimic_kernel:
        cast = lambda a: a.astype(jnp.bfloat16)
        gelu = _gelu_tanh
        prec = jax.lax.Precision.DEFAULT
    else:
        cast = lambda a: a.astype(jnp.float32)
        gelu = _gelu_erf
        prec = jax.lax.Precision.HIGHEST
    mm = functools.partial(jnp.einsum, preferred_element_type=jnp.float32,
                           precision=prec)

    emb = params['emb']
    B, S = tokens.shape
    D = emb.shape[1]
    H, hd = n_head, D // n_head
    scale = 1.0 / math.sqrt(hd)

    tok_emb = emb[tokens]
    h = tok_emb + params['pos'][:S][None]
    mask = jnp.tril(jnp.ones((S, S), dtype=bool))[None, None]
    for l in range(params['wq'].shape[0]):
        hn = _layer_norm(h, params['ln1w'][l], params['ln1b'][l])
        q = mm('bsd,df->bsf', cast(hn), cast(params['wq'][l])) * scale
        k = mm('bsd,df->bsf', cast(hn), cast(params['wk'][l]))
        v = mm('bsd,df->bsf', cast(tok_emb), cast(params['wv'][l]))
        qh = cast(q.reshape(B, S, H, hd).transpose(0, 2, 1, 3))
        kh = cast(k.reshape(B, S, H, hd).transpose(0, 2, 1, 3))
        vh = cast(v.reshape(B, S, H, hd).transpose(0, 2, 1, 3))
        s = mm('bhqc,bhkc->bhqk', qh, kh)
        s = jnp.where(mask, s, -jnp.inf)
        m = jnp.max(s, axis=-1, keepdims=True)
        e = jnp.exp(s - m)
        p = e / jnp.sum(e, axis=-1, keepdims=True)
        o = mm('bhqk,bhkc->bhqc', cast(p), vh)
        o = o.transpose(0, 2, 1, 3).reshape(B, S, D)
        h = h + mm('bsd,df->bsf', cast(o), cast(params['wo'][l]))
        hn2 = _layer_norm(h, params['ln2w'][l], params['ln2b'][l])
        f1 = mm('bsd,df->bsf', cast(hn2), cast(params['w1'][l]))
        h = h + mm('bsf,fd->bsd', cast(gelu(f1)), cast(params['w2'][l]))
    hf = _layer_norm(h, params['lnfw'], params['lnfb'])
    return mm('bsd,dv->bsv', cast(hf), cast(params['emb_T']))


# ----------------------------------------------------------------- params ---

def xavier_uniform(key, fan_in, fan_out):
    bound = math.sqrt(6.0 / (fan_in + fan_out))
    return jax.random.uniform(key, (fan_in, fan_out), jnp.float32, -bound, bound)


def init_params(key, vocab, d_model, max_seq_len, n_layers, ff_mult):
    keys = jax.random.split(key, 2 + 6 * n_layers)
    F = ff_mult * d_model
    # round the (tied) embedding to bf16 once so the f32 gather path and the
    # bf16 LM-head path use identical weight values (exact weight tying).
    emb = (0.02 * jax.random.normal(keys[0], (vocab, d_model), jnp.float32)
           ).astype(jnp.bfloat16).astype(jnp.float32)
    pos = 0.02 * jax.random.normal(keys[1], (max_seq_len, d_model), jnp.float32)

    layers = []
    for i in range(n_layers):
        k = keys[2 + 6 * i: 2 + 6 * (i + 1)]
        layers.append(dict(
            wq=xavier_uniform(k[0], d_model, d_model),
            wk=xavier_uniform(k[1], d_model, d_model),
            wv=xavier_uniform(k[2], d_model, d_model),
            wo=xavier_uniform(k[3], d_model, d_model),
            w1=xavier_uniform(k[4], d_model, F),
            w2=xavier_uniform(k[5], F, d_model),
        ))

    params = {
        'emb': emb,                                   # (V, D) f32 (bf16-exact)
        'emb_T': emb.T.astype(jnp.bfloat16),          # (D, V) pre-transposed tied head
        'pos': pos,
        'lnfw': jnp.ones((1, d_model), jnp.float32),
        'lnfb': jnp.zeros((1, d_model), jnp.float32),
        'ln1w': jnp.ones((n_layers, 1, d_model), jnp.float32),
        'ln1b': jnp.zeros((n_layers, 1, d_model), jnp.float32),
        'ln2w': jnp.ones((n_layers, 1, d_model), jnp.float32),
        'ln2b': jnp.zeros((n_layers, 1, d_model), jnp.float32),
    }
    for name in ('wq', 'wk', 'wv', 'wo', 'w1', 'w2'):
        params[name] = jnp.stack([lyr[name] for lyr in layers]).astype(jnp.bfloat16)
    return params


# ------------------------------------------------------------------- main ---

if __name__ == "__main__":
    VOCAB, D_MODEL, MAX_SEQ, N_LAYERS, N_HEAD, FF_MULT = 64, 32, 16, 2, 4, 4
    B, S = 2, 8

    root = jax.random.PRNGKey(0)
    pkey, tkey = jax.random.split(root)
    params = init_params(pkey, VOCAB, D_MODEL, MAX_SEQ, N_LAYERS, FF_MULT)
    tokens = jax.random.randint(tkey, (B, S), 0, VOCAB, dtype=jnp.int32)

    logits = jax.block_until_ready(gpt_forward_pallas(tokens, params, N_HEAD))
    assert logits.shape == (B, S, VOCAB)

    # tight parity check vs. a pure-JAX model mirroring the kernels' math
    mirror = gpt_forward_ref(tokens, params, N_HEAD, mimic_kernel=True)
    err_mirror = float(jnp.max(jnp.abs(logits - mirror)))
    assert jnp.allclose(logits, mirror, atol=1e-4, rtol=1e-4), \
        f"mirror-ref max abs err {err_mirror}"

    # loose check vs. faithful f32 / erf-GELU math (mixed-precision drift only)
    ref = gpt_forward_ref(tokens, params, N_HEAD, mimic_kernel=False)
    err_f32 = float(jnp.max(jnp.abs(logits - ref)))
    assert jnp.allclose(logits, ref, atol=3e-2, rtol=3e-2), \
        f"f32-ref max abs err {err_f32}"

    print("KERNEL_OK")
</pallas_src>

<mosaic_0001>
module attributes {stable_mosaic.version = 11 : i64} {
  func.func @gpt_blocks_kernel(%arg0: i32, %arg1: i32, %arg2: memref<1x8x32xf32, #tpu.memory_space<vmem>>, %arg3: memref<1x8x32xf32, #tpu.memory_space<vmem>>, %arg4: memref<1x1x32xf32, #tpu.memory_space<vmem>>, %arg5: memref<1x1x32xf32, #tpu.memory_space<vmem>>, %arg6: memref<1x32x32xbf16, #tpu.memory_space<vmem>>, %arg7: memref<1x32x32xbf16, #tpu.memory_space<vmem>>, %arg8: memref<1x32x32xbf16, #tpu.memory_space<vmem>>, %arg9: memref<1x32x32xbf16, #tpu.memory_space<vmem>>, %arg10: memref<1x1x32xf32, #tpu.memory_space<vmem>>, %arg11: memref<1x1x32xf32, #tpu.memory_space<vmem>>, %arg12: memref<1x32x128xbf16, #tpu.memory_space<vmem>>, %arg13: memref<1x128x32xbf16, #tpu.memory_space<vmem>>, %arg14: memref<1x8x32xf32, #tpu.memory_space<vmem>>, %arg15: memref<8x32xf32, #tpu.memory_space<vmem>>) attributes {dimension_semantics = [#tpu.dimension_semantics<parallel>, #tpu.dimension_semantics<arbitrary>], iteration_bounds = array<i64: 2, 2>, scalar_prefetch = 0 : i64, scratch_operands = 1 : i64, tpu.core_type = #tpu.core_type<tc>, window_params = [{transform_indices = @transform_0, window_bounds = array<i64: 1, 8, 32>}, {transform_indices = @transform_1, window_bounds = array<i64: 1, 8, 32>}, {transform_indices = @transform_2, window_bounds = array<i64: 1, 1, 32>}, {transform_indices = @transform_3, window_bounds = array<i64: 1, 1, 32>}, {transform_indices = @transform_4, window_bounds = array<i64: 1, 32, 32>}, {transform_indices = @transform_5, window_bounds = array<i64: 1, 32, 32>}, {transform_indices = @transform_6, window_bounds = array<i64: 1, 32, 32>}, {transform_indices = @transform_7, window_bounds = array<i64: 1, 32, 32>}, {transform_indices = @transform_8, window_bounds = array<i64: 1, 1, 32>}, {transform_indices = @transform_9, window_bounds = array<i64: 1, 1, 32>}, {transform_indices = @transform_10, window_bounds = array<i64: 1, 32, 128>}, {transform_indices = @transform_11, window_bounds = array<i64: 1, 128, 32>}, {transform_indices = @transform_12, window_bounds = array<i64: 1, 8, 32>}]} {
    %c0_i32 = arith.constant 0 : i32
    %0 = arith.cmpi eq, %arg1, %c0_i32 : i32
    %1 = arith.extui %0 : i1 to i32
    %c0_i32_0 = arith.constant 0 : i32
    %2 = arith.cmpi ne, %1, %c0_i32_0 : i32
    scf.if %2 {
      %c0_63 = arith.constant 0 : index
      %c0_64 = arith.constant 0 : index
      %c0_65 = arith.constant 0 : index
      %134 = vector.load %arg2[%c0_63, %c0_64, %c0_65] : memref<1x8x32xf32, #tpu.memory_space<vmem>>, vector<1x8x32xf32>
      %135 = vector.shape_cast %134 : vector<1x8x32xf32> to vector<8x32xf32>
      %c0_66 = arith.constant 0 : index
      %c0_67 = arith.constant 0 : index
      %136 = vector.load %arg15[%c0_66, %c0_67] : memref<8x32xf32, #tpu.memory_space<vmem>>, vector<8x32xf32>
      tpu.vector_store %arg15[%c0_66, %c0_67], %135 {strides = array<i32>} : memref<8x32xf32, #tpu.memory_space<vmem>>, vector<8x32xf32>,
    } else {
    }
    %c0 = arith.constant 0 : index
    %c0_1 = arith.constant 0 : index
    %3 = vector.load %arg15[%c0, %c0_1] : memref<8x32xf32, #tpu.memory_space<vmem>>, vector<8x32xf32>
    %c0_2 = arith.constant 0 : index
    %c0_3 = arith.constant 0 : index
    %c0_4 = arith.constant 0 : index
    %4 = vector.load %arg3[%c0_2, %c0_3, %c0_4] : memref<1x8x32xf32, #tpu.memory_space<vmem>>, vector<1x8x32xf32>
    %5 = vector.shape_cast %4 : vector<1x8x32xf32> to vector<8x32xf32>
    %c0_5 = arith.constant 0 : index
    %c0_6 = arith.constant 0 : index
    %c0_7 = arith.constant 0 : index
    %6 = vector.load %arg4[%c0_5, %c0_6, %c0_7] : memref<1x1x32xf32, #tpu.memory_space<vmem>>, vector<1x1x32xf32>
    %7 = vector.shape_cast %6 : vector<1x1x32xf32> to vector<1x32xf32>
    %c0_8 = arith.constant 0 : index
    %c0_9 = arith.constant 0 : index
    %c0_10 = arith.constant 0 : index
    %8 = vector.load %arg5[%c0_8, %c0_9, %c0_10] : memref<1x1x32xf32, #tpu.memory_space<vmem>>, vector<1x1x32xf32>
    %9 = vector.shape_cast %8 : vector<1x1x32xf32> to vector<1x32xf32>
    %cst = arith.constant dense<0.000000e+00> : vector<8xf32>
    %10 = vector.multi_reduction <add>, %3, %cst [1] : vector<8x32xf32> to vector<8xf32>
    %11 = vector.shape_cast %10 : vector<8xf32> to vector<8x1xf32>
    %cst_11 = arith.constant 3.200000e+01 : f32
    %12 = vector.broadcast %cst_11 : f32 to vector<8x1xf32>
    %13 = arith.divf %11, %12 : vector<8x1xf32>
    %14 = vector.broadcast %13 : vector<8x1xf32> to vector<8x32xf32>
    %15 = arith.subf %3, %14 : vector<8x32xf32>
    %16 = arith.mulf %15, %15 : vector<8x32xf32>
    %cst_12 = arith.constant dense<0.000000e+00> : vector<8xf32>
    %17 = vector.multi_reduction <add>, %16, %cst_12 [1] : vector<8x32xf32> to vector<8xf32>
    %18 = vector.shape_cast %17 : vector<8xf32> to vector<8x1xf32>
    %cst_13 = arith.constant 3.200000e+01 : f32
    %19 = vector.broadcast %cst_13 : f32 to vector<8x1xf32>
    %20 = arith.divf %18, %19 : vector<8x1xf32>
    %21 = vector.broadcast %13 : vector<8x1xf32> to vector<8x32xf32>
    %22 = arith.subf %3, %21 : vector<8x32xf32>
    %cst_14 = arith.constant 9.99999974E-6 : f32
    %23 = vector.broadcast %cst_14 : f32 to vector<8x1xf32>
    %24 = arith.addf %20, %23 : vector<8x1xf32>
    %25 = math.rsqrt %24 : vector<8x1xf32>
    %26 = vector.broadcast %25 : vector<8x1xf32> to vector<8x32xf32>
    %27 = arith.mulf %22, %26 : vector<8x32xf32>
    %28 = vector.broadcast %7 : vector<1x32xf32> to vector<8x32xf32>
    %29 = arith.mulf %27, %28 : vector<8x32xf32>
    %30 = vector.broadcast %9 : vector<1x32xf32> to vector<8x32xf32>
    %31 = arith.addf %29, %30 : vector<8x32xf32>
    %32 = arith.truncf %31 : vector<8x32xf32> to vector<8x32xbf16>
    %c0_15 = arith.constant 0 : index
    %c0_16 = arith.constant 0 : index
    %c0_17 = arith.constant 0 : index
    %33 = vector.load %arg6[%c0_15, %c0_16, %c0_17] : memref<1x32x32xbf16, #tpu.memory_space<vmem>>, vector<1x32x32xbf16>
    %34 = vector.shape_cast %33 : vector<1x32x32xbf16> to vector<32x32xbf16>
    %cst_18 = arith.constant dense<0.000000e+00> : vector<8x32xf32>
    %35 = tpu.matmul %32, %34, %cst_18 {dimension_numbers = #tpu.dot_dimension_numbers<[1], [0], [0], [1], [0, 0, 1, 1], [], []>} : vector<8x32xbf16>, vector<32x32xbf16>, vector<8x32xf32> -> vector<8x32xf32>
    %cst_19 = arith.constant 0.353553385 : f32
    %36 = vector.broadcast %cst_19 : f32 to vector<8x32xf32>
    %37 = arith.mulf %35, %36 : vector<8x32xf32>
    %c0_20 = arith.constant 0 : index
    %c0_21 = arith.constant 0 : index
    %c0_22 = arith.constant 0 : index
    %38 = vector.load %arg7[%c0_20, %c0_21, %c0_22] : memref<1x32x32xbf16, #tpu.memory_space<vmem>>, vector<1x32x32xbf16>
    %39 = vector.shape_cast %38 : vector<1x32x32xbf16> to vector<32x32xbf16>
    %cst_23 = arith.constant dense<0.000000e+00> : vector<8x32xf32>
    %40 = tpu.matmul %32, %39, %cst_23 {dimension_numbers = #tpu.dot_dimension_numbers<[1], [0], [0], [1], [0, 0, 1, 1], [], []>} : vector<8x32xbf16>, vector<32x32xbf16>, vector<8x32xf32> -> vector<8x32xf32>
    %41 = arith.truncf %5 : vector<8x32xf32> to vector<8x32xbf16>
    %c0_24 = arith.constant 0 : index
    %c0_25 = arith.constant 0 : index
    %c0_26 = arith.constant 0 : index
    %42 = vector.load %arg8[%c0_24, %c0_25, %c0_26] : memref<1x32x32xbf16, #tpu.memory_space<vmem>>, vector<1x32x32xbf16>
    %43 = vector.shape_cast %42 : vector<1x32x32xbf16> to vector<32x32xbf16>
    %cst_27 = arith.constant dense<0.000000e+00> : vector<8x32xf32>
    %44 = tpu.matmul %41, %43, %cst_27 {dimension_numbers = #tpu.dot_dimension_numbers<[1], [0], [0], [1], [0, 0, 1, 1], [], []>} : vector<8x32xbf16>, vector<32x32xbf16>, vector<8x32xf32> -> vector<8x32xf32>
    %45 = vector.shape_cast %37 : vector<8x32xf32> to vector<8x4x8xf32>
    %46 = tpu.transpose %45, [1, 0, 2] : vector<8x4x8xf32> -> vector<4x8x8xf32>
    %47 = arith.truncf %46 : vector<4x8x8xf32> to vector<4x8x8xbf16>
    %48 = vector.shape_cast %40 : vector<8x32xf32> to vector<8x4x8xf32>
    %49 = tpu.transpose %48, [1, 0, 2] : vector<8x4x8xf32> -> vector<4x8x8xf32>
    %50 = arith.truncf %49 : vector<4x8x8xf32> to vector<4x8x8xbf16>
    %51 = vector.shape_cast %44 : vector<8x32xf32> to vector<8x4x8xf32>
    %52 = tpu.transpose %51, [1, 0, 2] : vector<8x4x8xf32> -> vector<4x8x8xf32>
    %53 = arith.truncf %52 : vector<4x8x8xf32> to vector<4x8x8xbf16>
    "tpu.trace_start"() <{level = 10 : i32, message = "hqc,hkc->hqk"}> : () -> ()
    %cst_28 = arith.constant dense<0.000000e+00> : vector<4x8x8xf32>
    %54 = tpu.matmul %47, %50, %cst_28 {dimension_numbers = #tpu.dot_dimension_numbers<[2], [2], [1], [1], [0, 0, 0, 1, 1, 1], [0], [0]>} : vector<4x8x8xbf16>, vector<4x8x8xbf16>, vector<4x8x8xf32> -> vector<4x8x8xf32>
    "tpu.trace_stop"() : () -> ()
    %55 = tpu.iota {dimensions = array<i32: 0>} : vector<8x8xi32>
    %56 = tpu.iota {dimensions = array<i32: 1>} : vector<8x8xi32>
    %57 = arith.cmpi sle, %56, %55 : vector<8x8xi32>
    %58 = vector.shape_cast %57 : vector<8x8xi1> to vector<1x8x8xi1>
    %cst_29 = arith.constant 0xFF800000 : f32
    %59 = vector.shape_cast %58 : vector<1x8x8xi1> to vector<1x8x8xi1>
    %60 = vector.broadcast %59 : vector<1x8x8xi1> to vector<4x8x8xi1>
    %61 = vector.broadcast %cst_29 : f32 to vector<4x8x8xf32>
    %62 = arith.select %60, %54, %61 : vector<4x8x8xi1>, vector<4x8x8xf32>
    %cst_30 = arith.constant dense<0xFF800000> : vector<4x8xf32>
    %63 = vector.multi_reduction <maximumf>, %62, %cst_30 [2] : vector<4x8x8xf32> to vector<4x8xf32>
    %64 = vector.shape_cast %63 : vector<4x8xf32> to vector<4x8x1xf32>
    %65 = vector.broadcast %64 : vector<4x8x1xf32> to vector<4x8x8xf32>
    %66 = arith.subf %62, %65 : vector<4x8x8xf32>
    %67 = math.exp %66 : vector<4x8x8xf32>
    %cst_31 = arith.constant dense<0.000000e+00> : vector<4x8xf32>
    %68 = vector.multi_reduction <add>, %67, %cst_31 [2] : vector<4x8x8xf32> to vector<4x8xf32>
    %69 = vector.shape_cast %68 : vector<4x8xf32> to vector<4x8x1xf32>
    %70 = tpu.reciprocal %69 : vector<4x8x1xf32> -> vector<4x8x1xf32>
    %71 = vector.broadcast %70 : vector<4x8x1xf32> to vector<4x8x8xf32>
    %72 = arith.mulf %67, %71 : vector<4x8x8xf32>
    %73 = arith.truncf %72 : vector<4x8x8xf32> to vector<4x8x8xbf16>
    "tpu.trace_start"() <{level = 10 : i32, message = "hqk,hkc->hqc"}> : () -> ()
    %cst_32 = arith.constant dense<0.000000e+00> : vector<4x8x8xf32>
    %74 = tpu.matmul %73, %53, %cst_32 {dimension_numbers = #tpu.dot_dimension_numbers<[2], [1], [1], [2], [0, 0, 0, 1, 1, 2], [0], [0]>} : vector<4x8x8xbf16>, vector<4x8x8xbf16>, vector<4x8x8xf32> -> vector<4x8x8xf32>
    "tpu.trace_stop"() : () -> ()
    %75 = tpu.transpose %74, [1, 0, 2] : vector<4x8x8xf32> -> vector<8x4x8xf32>
    %76 = vector.shape_cast %75 : vector<8x4x8xf32> to vector<8x32xf32>
    %77 = arith.truncf %76 : vector<8x32xf32> to vector<8x32xbf16>
    %c0_33 = arith.constant 0 : index
    %c0_34 = arith.constant 0 : index
    %c0_35 = arith.constant 0 : index
    %78 = vector.load %arg9[%c0_33, %c0_34, %c0_35] : memref<1x32x32xbf16, #tpu.memory_space<vmem>>, vector<1x32x32xbf16>
    %79 = vector.shape_cast %78 : vector<1x32x32xbf16> to vector<32x32xbf16>
    %cst_36 = arith.constant dense<0.000000e+00> : vector<8x32xf32>
    %80 = tpu.matmul %77, %79, %cst_36 {dimension_numbers = #tpu.dot_dimension_numbers<[1], [0], [0], [1], [0, 0, 1, 1], [], []>} : vector<8x32xbf16>, vector<32x32xbf16>, vector<8x32xf32> -> vector<8x32xf32>
    %81 = arith.addf %3, %80 : vector<8x32xf32>
    %c0_37 = arith.constant 0 : index
    %c0_38 = arith.constant 0 : index
    %c0_39 = arith.constant 0 : index
    %82 = vector.load %arg10[%c0_37, %c0_38, %c0_39] : memref<1x1x32xf32, #tpu.memory_space<vmem>>, vector<1x1x32xf32>
    %83 = vector.shape_cast %82 : vector<1x1x32xf32> to vector<1x32xf32>
    %c0_40 = arith.constant 0 : index
    %c0_41 = arith.constant 0 : index
    %c0_42 = arith.constant 0 : index
    %84 = vector.load %arg11[%c0_40, %c0_41, %c0_42] : memref<1x1x32xf32, #tpu.memory_space<vmem>>, vector<1x1x32xf32>
    %85 = vector.shape_cast %84 : vector<1x1x32xf32> to vector<1x32xf32>
    %cst_43 = arith.constant dense<0.000000e+00> : vector<8xf32>
    %86 = vector.multi_reduction <add>, %81, %cst_43 [1] : vector<8x32xf32> to vector<8xf32>
    %87 = vector.shape_cast %86 : vector<8xf32> to vector<8x1xf32>
    %cst_44 = arith.constant 3.200000e+01 : f32
    %88 = vector.broadcast %cst_44 : f32 to vector<8x1xf32>
    %89 = arith.divf %87, %88 : vector<8x1xf32>
    %90 = vector.broadcast %89 : vector<8x1xf32> to vector<8x32xf32>
    %91 = arith.subf %81, %90 : vector<8x32xf32>
    %92 = arith.mulf %91, %91 : vector<8x32xf32>
    %cst_45 = arith.constant dense<0.000000e+00> : vector<8xf32>
    %93 = vector.multi_reduction <add>, %92, %cst_45 [1] : vector<8x32xf32> to vector<8xf32>
    %94 = vector.shape_cast %93 : vector<8xf32> to vector<8x1xf32>
    %cst_46 = arith.constant 3.200000e+01 : f32
    %95 = vector.broadcast %cst_46 : f32 to vector<8x1xf32>
    %96 = arith.divf %94, %95 : vector<8x1xf32>
    %97 = vector.broadcast %89 : vector<8x1xf32> to vector<8x32xf32>
    %98 = arith.subf %81, %97 : vector<8x32xf32>
    %cst_47 = arith.constant 9.99999974E-6 : f32
    %99 = vector.broadcast %cst_47 : f32 to vector<8x1xf32>
    %100 = arith.addf %96, %99 : vector<8x1xf32>
    %101 = math.rsqrt %100 : vector<8x1xf32>
    %102 = vector.broadcast %101 : vector<8x1xf32> to vector<8x32xf32>
    %103 = arith.mulf %98, %102 : vector<8x32xf32>
    %104 = vector.broadcast %83 : vector<1x32xf32> to vector<8x32xf32>
    %105 = arith.mulf %103, %104 : vector<8x32xf32>
    %106 = vector.broadcast %85 : vector<1x32xf32> to vector<8x32xf32>
    %107 = arith.addf %105, %106 : vector<8x32xf32>
    %108 = arith.truncf %107 : vector<8x32xf32> to vector<8x32xbf16>
    %c0_48 = arith.constant 0 : index
    %c0_49 = arith.constant 0 : index
    %c0_50 = arith.constant 0 : index
    %109 = vector.load %arg12[%c0_48, %c0_49, %c0_50] : memref<1x32x128xbf16, #tpu.memory_space<vmem>>, vector<1x32x128xbf16>
    %110 = vector.shape_cast %109 : vector<1x32x128xbf16> to vector<32x128xbf16>
    %cst_51 = arith.constant dense<0.000000e+00> : vector<8x128xf32>
    %111 = tpu.matmul %108, %110, %cst_51 {dimension_numbers = #tpu.dot_dimension_numbers<[1], [0], [0], [1], [0, 0, 1, 1], [], []>} : vector<8x32xbf16>, vector<32x128xbf16>, vector<8x128xf32> -> vector<8x128xf32>
    %cst_52 = arith.constant 5.000000e-01 : f32
    %112 = vector.broadcast %cst_52 : f32 to vector<8x128xf32>
    %113 = arith.mulf %112, %111 : vector<8x128xf32>
    %cst_53 = arith.constant 4.471500e-02 : f32
    %114 = vector.broadcast %cst_53 : f32 to vector<8x128xf32>
    %115 = arith.mulf %114, %111 : vector<8x128xf32>
    %116 = arith.mulf %115, %111 : vector<8x128xf32>
    %117 = arith.mulf %116, %111 : vector<8x128xf32>
    %118 = arith.addf %111, %117 : vector<8x128xf32>
    %cst_54 = arith.constant 0.797884583 : f32
    %119 = vector.broadcast %cst_54 : f32 to vector<8x128xf32>
    %120 = arith.mulf %119, %118 : vector<8x128xf32>
    %121 = math.tanh %120 : vector<8x128xf32>
    %cst_55 = arith.constant 1.000000e+00 : f32
    %122 = vector.broadcast %cst_55 : f32 to vector<8x128xf32>
    %123 = arith.addf %122, %121 : vector<8x128xf32>
    %124 = arith.mulf %113, %123 : vector<8x128xf32>
    %125 = arith.truncf %124 : vector<8x128xf32> to vector<8x128xbf16>
    %c0_56 = arith.constant 0 : index
    %c0_57 = arith.constant 0 : index
    %c0_58 = arith.constant 0 : index
    %126 = vector.load %arg13[%c0_56, %c0_57, %c0_58] : memref<1x128x32xbf16, #tpu.memory_space<vmem>>, vector<1x128x32xbf16>
    %127 = vector.shape_cast %126 : vector<1x128x32xbf16> to vector<128x32xbf16>
    %cst_59 = arith.constant dense<0.000000e+00> : vector<8x32xf32>
    %128 = tpu.matmul %125, %127, %cst_59 {dimension_numbers = #tpu.dot_dimension_numbers<[1], [0], [0], [1], [0, 0, 1, 1], [], []>} : vector<8x128xbf16>, vector<128x32xbf16>, vector<8x32xf32> -> vector<8x32xf32>
    %129 = arith.addf %81, %128 : vector<8x32xf32>
    %c0_60 = arith.constant 0 : index
    %c0_61 = arith.constant 0 : index
    %130 = vector.load %arg15[%c0_60, %c0_61] : memref<8x32xf32, #tpu.memory_space<vmem>>, vector<8x32xf32>
    tpu.vector_store %arg15[%c0_60, %c0_61], %129 {strides = array<i32>} : memref<8x32xf32, #tpu.memory_space<vmem>>, vector<8x32xf32>,
    %c1_i32 = arith.constant 1 : i32
    %131 = arith.cmpi eq, %arg1, %c1_i32 : i32
    %132 = arith.extui %131 : i1 to i32
    %c0_i32_62 = arith.constant 0 : i32
    %133 = arith.cmpi ne, %132, %c0_i32_62 : i32
    scf.if %133 {
      %c0_63 = arith.constant 0 : index
      %c0_64 = arith.constant 0 : index
      %c0_65 = arith.constant 0 : index
      %134 = vector.load %arg14[%c0_63, %c0_64, %c0_65] : memref<1x8x32xf32, #tpu.memory_space<vmem>>, vector<1x8x32xf32>
      %135 = vector.shape_cast %134 : vector<1x8x32xf32> to vector<8x32xf32>
      %136 = vector.shape_cast %129 : vector<8x32xf32> to vector<1x8x32xf32>
      tpu.vector_store %arg14[%c0_63, %c0_64, %c0_65], %136 {strides = array<i32>} : memref<1x8x32xf32, #tpu.memory_space<vmem>>, vector<1x8x32xf32>,
    } else {
    }
    return
  }
  func.func @transform_0(%arg0: i32, %arg1: i32) -> (i32, i32, i32) {
    %c0_i32 = arith.constant 0 : i32
    %c0_i32_0 = arith.constant 0 : i32
    %c0_i32_1 = arith.constant 0 : i32
    return %arg0, %c0_i32, %c0_i32_0 : i32, i32, i32
  }
  func.func @transform_1(%arg0: i32, %arg1: i32) -> (i32, i32, i32) {
    %c0_i32 = arith.constant 0 : i32
    %c0_i32_0 = arith.constant 0 : i32
    %c0_i32_1 = arith.constant 0 : i32
    return %arg0, %c0_i32, %c0_i32_0 : i32, i32, i32
  }
  func.func @transform_2(%arg0: i32, %arg1: i32) -> (i32, i32, i32) {
    %c0_i32 = arith.constant 0 : i32
    %c0_i32_0 = arith.constant 0 : i32
    %c0_i32_1 = arith.constant 0 : i32
    return %arg1, %c0_i32, %c0_i32_0 : i32, i32, i32
  }
  func.func @transform_3(%arg0: i32, %arg1: i32) -> (i32, i32, i32) {
    %c0_i32 = arith.constant 0 : i32
    %c0_i32_0 = arith.constant 0 : i32
    %c0_i32_1 = arith.constant 0 : i32
    return %arg1, %c0_i32, %c0_i32_0 : i32, i32, i32
  }
  func.func @transform_4(%arg0: i32, %arg1: i32) -> (i32, i32, i32) {
    %c0_i32 = arith.constant 0 : i32
    %c0_i32_0 = arith.constant 0 : i32
    %c0_i32_1 = arith.constant 0 : i32
    return %arg1, %c0_i32, %c0_i32_0 : i32, i32, i32
  }
  func.func @transform_5(%arg0: i32, %arg1: i32) -> (i32, i32, i32) {
    %c0_i32 = arith.constant 0 : i32
    %c0_i32_0 = arith.constant 0 : i32
    %c0_i32_1 = arith.constant 0 : i32
    return %arg1, %c0_i32, %c0_i32_0 : i32, i32, i32
  }
  func.func @transform_6(%arg0: i32, %arg1: i32) -> (i32, i32, i32) {
    %c0_i32 = arith.constant 0 : i32
    %c0_i32_0 = arith.constant 0 : i32
    %c0_i32_1 = arith.constant 0 : i32
    return %arg1, %c0_i32, %c0_i32_0 : i32, i32, i32
  }
  func.func @transform_7(%arg0: i32, %arg1: i32) -> (i32, i32, i32) {
    %c0_i32 = arith.constant 0 : i32
    %c0_i32_0 = arith.constant 0 : i32
    %c0_i32_1 = arith.constant 0 : i32
    return %arg1, %c0_i32, %c0_i32_0 : i32, i32, i32
  }
  func.func @transform_8(%arg0: i32, %arg1: i32) -> (i32, i32, i32) {
    %c0_i32 = arith.constant 0 : i32
    %c0_i32_0 = arith.constant 0 : i32
    %c0_i32_1 = arith.constant 0 : i32
    return %arg1, %c0_i32, %c0_i32_0 : i32, i32, i32
  }
  func.func @transform_9(%arg0: i32, %arg1: i32) -> (i32, i32, i32) {
    %c0_i32 = arith.constant 0 : i32
    %c0_i32_0 = arith.constant 0 : i32
    %c0_i32_1 = arith.constant 0 : i32
    return %arg1, %c0_i32, %c0_i32_0 : i32, i32, i32
  }
  func.func @transform_10(%arg0: i32, %arg1: i32) -> (i32, i32, i32) {
    %c0_i32 = arith.constant 0 : i32
    %c0_i32_0 = arith.constant 0 : i32
    %c0_i32_1 = arith.constant 0 : i32
    return %arg1, %c0_i32, %c0_i32_0 : i32, i32, i32
  }
  func.func @transform_11(%arg0: i32, %arg1: i32) -> (i32, i32, i32) {
    %c0_i32 = arith.constant 0 : i32
    %c0_i32_0 = arith.constant 0 : i32
    %c0_i32_1 = arith.constant 0 : i32
    return %arg1, %c0_i32, %c0_i32_0 : i32, i32, i32
  }
  func.func @transform_12(%arg0: i32, %arg1: i32) -> (i32, i32, i32) {
    %c0_i32 = arith.constant 0 : i32
    %c0_i32_0 = arith.constant 0 : i32
    %c0_i32_1 = arith.constant 0 : i32
    return %arg0, %c0_i32, %c0_i32_0 : i32, i32, i32
  }
}

</mosaic_0001>

<bundles_post_ra>
// kernel: tpu_custom_call.1
= control target key start
LH: loop header
LB: loop body
LE: loop exit
PB: predicated region body
PF: predicated region fallthrough
CT: control target
= control target key end

     0   :  { %s3553_s0 = inlined_call_operand.hbm [shape: f32[2,8,32], index: 0, kind: input, shape index: {}]   ;;  %s3554_s1 = inlined_call_operand.hbm [shape: f32[2,8,32], index: 1, kind: input, shape index: {}]   ;;  %s3555_s2 = inlined_call_operand.vmem [shape: f32[2,1,32], index: 2, kind: input, shape index: {}]   ;;  %s3556_s3 = inlined_call_operand.vmem [shape: f32[2,1,32], index: 3, kind: input, shape index: {}]   ;;  %s3557_s4 = inlined_call_operand.vmem [shape: bf16[2,32,32], index: 4, kind: input, shape index: {}]   ;;  %s3558_s5 = inlined_call_operand.vmem [shape: bf16[2,32,32], index: 5, kind: input, shape index: {}]   ;;  %s3559_s6 = inlined_call_operand.vmem [shape: bf16[2,32,32], index: 6, kind: input, shape index: {}]   ;;  %s3560_s7 = inlined_call_operand.vmem [shape: bf16[2,32,32], index: 7, kind: input, shape index: {}]   ;;  %s3561_s8 = inlined_call_operand.vmem [shape: f32[2,1,32], index: 8, kind: input, shape index: {}]   ;;  %s3562_s9 = inlined_call_operand.vmem [shape: f32[2,1,32], index: 9, kind: input, shape index: {}]   ;;  %s3563_s10 = inlined_call_operand.vmem [shape: bf16[2,32,128], index: 10, kind: input, shape index: {}]   ;;  %s3564_s11 = inlined_call_operand.vmem [shape: bf16[2,128,32], index: 11, kind: input, shape index: {}]   ;;  %s3565_s12 = inlined_call_operand.hbm [shape: f32[2,8,32], index: 12, kind: output, shape index: {}]  }
   0x1   :  { %3583 = sst [smem:[#allocation24_spill]] %s3553_s0 }
   0x2   :  { %3584 = sst [smem:[#allocation25_spill]] %s3554_s1 }
   0x3   :  { %3585 = sst [smem:[#allocation26_spill]] %s3557_s4 }
   0x4   :  { %3586 = sst [smem:[#allocation27_spill]] %s3558_s5 }
   0x5   :  { %3587 = sst [smem:[#allocation28_spill]] %s3565_s12 }
   0x6   :  { %17 = vsyncpa [#allocation4], 0 }
   0x7   :  { %19 = vsyncpa [#allocation4 + $0x1], 0 }
   0x8   :  { %20 = vsyncpa [#allocation7], 0 }
   0x9   :  { %22 = vsyncpa [#allocation7 + $0x1], 0 }
   0xa   :  { %23 = vsyncpa [#allocation5], 0 }
   0xb   :  { %25 = vsyncpa [#allocation5 + $0x1], 0  ;;  %s3003_s21 = smov 0   ;;  %s3005_s22 = smov 0  }
   0xc   :  { %s3007_s23 = smov 0   ;;  %s3009_s24 = smov 0  }
   0xd   :  { %s3011_s25 = smov 0   ;;  %s3013_s26 = smov 0  }
   0xe   :  { %s3015_s27 = smov 0   ;;  %s3017_s28 = smov 0  }
   0xf LB: > { %3588 = sst [smem:[#allocation12_spill]] %s2895_s21  ;;  %s2401_s29 = sadd.s32 4294967295, %s2923_s28   ;;  %s2923_s28 = sphi %s3017_s28, %s31_s28   ;;  %s2919_s27 = sphi %s3015_s27, %s3635_s27   ;;  %s2915_s26 = sphi %s3013_s26, %s3634_s26   ;;  %s2911_s25 = sphi %s3011_s25, %s3633_s25   ;;  %s2907_s24 = sphi %s3009_s24, %s3632_s24   ;;  %s2903_s23 = sphi %s3007_s23, %s3631_s23   ;;  %s2899_s22 = sphi %s3005_s22, %s3630_s22   ;;  %s2895_s21 = sphi %s3003_s21, %s3629_s21  }
  0x10   : > { %3589 = sst [smem:[#allocation13_spill]] %s2899_s22  ;;  %s2402_s30 = sadd.s32 4294967294, %s2923_s28  }
  0x11   : > { %3590 = sst [smem:[#allocation14_spill]] %s2903_s23  ;;  %s40_s13 = sadd.s32 1, %s2915_s26 }
  0x12   : > { %3591 = sst [smem:[#allocation15_spill]] %s2915_s26  ;;  %s43_s14 = sadd.s32 1, %s2919_s27 }
  0x13   : > { %3592 = sst [smem:[#allocation16_spill]] %s2919_s27  ;;  %p41_p0 = scmp.ge.s32.totalorder %s40_s13, 2 }
  0x14   : > { %3593 = sst [smem:[#allocation17_spill]] %s2923_s28  ;;  %s50_s15 = sadd.s32 1, %s2903_s23 }
  0x15   : > { %p57_p1 = scmp.ne.s32.totalorder %s2903_s23, %s2899_s22  ;;  %p58_p2 = scmp.eq.s32.totalorder %s2923_s28, 0 }
  0x16   : > { %s3637_s13 = smov (%p41_p0, %s40_s13), 0  ;;  %s3639_s14 = smov (!%p41_p0, %s43_s14), %s2919_s27 }
  0x17   : > { %3594 = sst [smem:[#allocation18_spill]] %s3637_s13  ;;  %p3054_p3 = por %p58_p2, %p57_p1 }
  0x18   : > { %p63_p4 = scmp.ne.s32.totalorder %s2899_s22, %s2895_s21  ;;  %p45_p5 = scmp.ge.s32.totalorder %s3639_s14, 2 }
  0x19   : > { %p64_p6 = scmp.eq.s32.totalorder %s2401_s29, 0  ;;  %p373_p7 = scmp.eq.s32.totalorder %s2401_s29, 3 }
  0x1a   : > { %p379_p8 = scmp.eq.s32.totalorder %s2402_s30, 3  ;;  %s3641_s14 = smov (%p45_p5, %s3639_s14), 0 }
  0x1b   : > { %3596 = sst [smem:[#allocation19_spill]] %s3641_s14  ;;  %p3062_p9 = por %p64_p6, %p63_p4 }
  0x1c   : > { %p3066_p10 = por %p373_p7, %p57_p1  ;;  %s47_s19 = ssub.s32 %s2919_s27, %s3641_s14 }
  0x1d   : > { %s3597_s17 = scalar_select %p3062_p9, 1, 0 }
  0x1e   : > { %s3598_s18 = scalar_select %p3066_p10, 1, 0 }
  0x1f   : > { %p3072_p11 = por %p379_p8, %p63_p4  ;;  %p48_p12 = scmp.eq.s32.totalorder %s47_s19, 0 }
  0x20   : > { %3599 = sst [smem:[#allocation20_spill]] %s3598_s18  ;;  %p2645_p13 = scmp.lt.s32.totalorder %s2923_s28, 4 }
  0x21   : > { %s3600_s20 = scalar_select %p3072_p11, 1, 0 }
  0x22   : > { %s3078_s29 = sand.u32 1, %s2903_s23   ;;  %s3572_s26 = sshll.u32 %s2919_s27, 7 }
  0x23   : > { %3601 = sst [smem:[#allocation21_spill]] %s3600_s20  ;;  %s3571_s13 = sshll.u32 %s3078_s29, 3 }
  0x24   : > { %s3081_s30 = scalar_select %p48_p12, %s2903_s23, %s50_s15  }
  0x25   : > { %s3603_s0 = sld [smem:[#allocation24_spill]]  ;;  %s403_s19 = scalar_lea.vmem [#allocation3], %s3571_s13 }
  0x26   : > { %3602 = sst [smem:[#allocation22_spill]] %s3081_s30  ;;  %s410_s20 = sshll.u32 %s403_s19, 4  ;;  %s3094_s20 = int_to_ptr.vmem [resolvable:$true] %s410_s20 }
  0x27   : > { %p3098_p0 = pnand %p2645_p13, %p3054_p3  ;;  %s400_s12 = scalar_lea.sflag [#allocation4], %s3078_s29 }
  0x29   : > { %p2763_p5 = pneg %p3098_p0 }
  0x2b   : > { %s3090_s14 = scalar_lea.hbm %s3603_s0, %s3572_s26  ;;  %s2766_s16 = scalar_lea.hbm %s3603_s0, 256 }
  0x2c   : > { %s2761_s21 = scalar_lea.hbm %s3090_s14, 128  ;;  %p2767_p3 = scmp.lt.u32.totalorder %s3090_s14, %s3603_s0 }
  0x2d   : > { %p2762_p4 = scmp.ne.s32.totalorder %s3090_s14, %s2761_s21  ;;  %p2768_p8 = scmp.lt.u32.totalorder %s2766_s16, %s2761_s21 }
  0x2e   : > { %p2770_p13 = scmp.lt.u32.totalorder %s2761_s21, %s3090_s14 }
  0x2f   : > { %p2764_p6 = pnand %p2763_p5, %p2762_p4  ;;  %p2769_p12 = por %p2768_p8, %p2767_p3 }
  0x31   : > { %p2765_p7 = pneg %p2764_p6  ;;  %p2771_p1 = por %p2770_p13, %p2769_p12 }
  0x33   : > { %p2772_p2 = pnand %p2771_p1, %p2765_p7 }
  0x35   : > { %2775 = shalt.err (!%p2772_p2)
}
  0x36   : > { %s2776_s23 = scalar_lea.vmem %s3094_s20, 128  ;;  %s2925_s13 = smov [#allocation3]  }
  0x37   : > { %p2777_p4 = scmp.ne.s32.totalorder %s3094_s20, %s2776_s23  ;;  %s2781_s19 = sshll.u32 %s2925_s13, 4  ;;  %s2782_s19 = int_to_ptr.vmem [resolvable:$false] %s2781_s19 }
  0x38   : > { %s2783_s26 = scalar_lea.vmem %s2782_s19, 256  ;;  %p2784_p10 = scmp.lt.s32.totalorder %s3094_s20, %s2782_s19 }
  0x39   : > { %p2779_p6 = pnand %p2777_p4, %p2763_p5  ;;  %p2785_p3 = scmp.lt.s32.totalorder %s2783_s26, %s2776_s23 }
  0x3b   : > { %p2780_p11 = pneg %p2779_p6  ;;  %p2786_p8 = por %p2785_p3, %p2784_p10 }
  0x3d   : > { %p2787_p12 = pnand %p2786_p8, %p2780_p11 }
  0x3f   : > { %2790 = shalt.err (!%p2787_p12)
}
  0x40   : > { %2637 = dma.hbm_to_vmem [thread:$0]  (!%p3098_p0), %s3090_s14, 128, %s3094_s20, %s400_s12  }
  0x41   : > { %p3605_p1 = scmp.lt.s32.totalorder %s2923_s28, 5  ;;  %p3606_p2 = scmp.ge.s32.totalorder %s2923_s28, 1 }
  0x42   : > { %s3608_s23 = sshll.u32 %s2919_s27, 7  ;;  %s3609_s1 = sld [smem:[#allocation25_spill]] }
  0x43   : > { %p3134_p7 = pnand %p3606_p2, %p3605_p1  ;;  %s3610_s19 = sshll.u32 %s3078_s29, 3 }
  0x44   : > { %s421_s26 = scalar_lea.vmem [#allocation6], %s3610_s19  ;;  %s418_s14 = scalar_lea.sflag [#allocation7], %s3078_s29 }
  0x45   : > { %s3607_s30 = scalar_select %p3134_p7, 1, 0 }
  0x46   : > { %s428_s0 = sshll.u32 %s421_s26, 4  ;;  %s429_s0 = int_to_ptr.vmem [resolvable:$true] %s428_s0 }
  0x48   : > { %s3143_s13 = scalar_lea.hbm %s3609_s1, %s3608_s23  ;;  %s2796_s23 = scalar_lea.hbm %s3609_s1, 256 }
  0x49   : > { %s2791_s20 = scalar_lea.hbm %s3143_s13, 128  ;;  %p2797_p4 = scmp.lt.u32.totalorder %s3143_s13, %s3609_s1 }
  0x4a   : > { %p2792_p10 = scmp.ne.s32.totalorder %s3143_s13, %s2791_s20  ;;  %p2798_p6 = scmp.lt.u32.totalorder %s2796_s23, %s2791_s20 }
  0x4b   : > { %p2800_p8 = scmp.lt.u32.totalorder %s2791_s20, %s3143_s13 }
  0x4c   : > { %p2794_p11 = pnand %p2792_p10, %p2763_p5  ;;  %p2799_p3 = por %p2798_p6, %p2797_p4 }
  0x4e   : > { %p2795_p13 = pneg %p2794_p11  ;;  %p2801_p12 = por %p2800_p8, %p2799_p3 }
  0x50   : > { %p2802_p1 = pnand %p2801_p12, %p2795_p13 }
  0x52   : > { %2805 = shalt.err (!%p2802_p1)
}
  0x53   : > { %s2806_s29 = scalar_lea.vmem %s429_s0, 128  ;;  %s2926_s19 = smov [#allocation6]  }
  0x54   : > { %p2807_p2 = scmp.ne.s32.totalorder %s429_s0, %s2806_s29  ;;  %s2811_s27 = sshll.u32 %s2926_s19, 4  ;;  %s2812_s27 = int_to_ptr.vmem [resolvable:$false] %s2811_s27 }
  0x55   : > { %s2813_s26 = scalar_lea.vmem %s2812_s27, 256  ;;  %p2814_p9 = scmp.lt.s32.totalorder %s429_s0, %s2812_s27 }
  0x56   : > { %p2809_p10 = pnand %p2807_p2, %p2763_p5  ;;  %p2815_p7 = scmp.lt.s32.totalorder %s2813_s26, %s2806_s29 }
  0x58   : > { %p2810_p11 = pneg %p2809_p10  ;;  %p2816_p4 = por %p2815_p7, %p2814_p9 }
  0x5a   : > { %p2817_p6 = pnand %p2816_p4, %p2810_p11 }
  0x5c   : > { %2820 = shalt.err (!%p2817_p6)
}
  0x5d   : > { %2640 = dma.hbm_to_vmem [thread:$0]  (!%p3098_p0), %s3143_s13, 128, %s429_s0, %s418_s14  }
  0x5e   : > { %p3611_p13 = scmp.ne.s32.totalorder %s3607_s30, 0 }
  0x60   : > { %509 = sbr.rel (%p3611_p13) target bundleno = 2756 (0xac4), region = 68 }
  0x67   : > { %s3170_s20 = sand.u32 1, %s2899_s22   ;;  %p3613_p9 = scmp.ne.s32.totalorder %s3597_s17, 0 }
  0x68   : > { %3612 = sst [smem:[#allocation23_spill]] %s3170_s20  ;;  %s3173_s12 = sshll.u32 %s3170_s20, 3 }
  0x69   : > { %s512_s23 = scalar_lea.sflag [#allocation4], %s3170_s20  ;;  %s515_s21 = scalar_lea.vmem [#allocation3], %s3173_s12 }
  0x6a   : > { %2882 = dma.done.wait (%p3613_p9), %s512_s23, 128  }
  0x6b   : > { %2884 = vsyncadd (%p3613_p9), %s512_s23, 4294967168  ;;  %s521_s0 = scalar_lea.sflag [#allocation7], %s3170_s20 }
  0x6c   : > { %2886 = dma.done.wait (%p3613_p9), %s521_s0, 128  }
  0x6d   : > { %2888 = vsyncadd (%p3613_p9), %s521_s0, 4294967168  ;;  %p612_p0 = scmp.lt.s32.totalorder %s2907_s24, 1  ;;  %s3614_s4 = sld [smem:[#allocation26_spill]] }
  0x6e   : > { %s3615_s5 = sld [smem:[#allocation27_spill]]  ;;  %s611_s16 = scalar_lea.vmem [#allocation8], %s3173_s12 }
  0x6f   : > { %s3189_s30 = scalar_select %p612_p0, %s2907_s24, 1 }
  0x70   : > { %p2425_p5 = scmp.ne.s32.totalorder %s2907_s24, 0 }
  0x71   : > { %s2474_s27 = sshll.u32 %s3189_s30, 4  ;;  %s643_s1 = scalar_lea.vmem %s3562_s9, %s3189_s30  ;;  %v659_v0 = vld [vmem:[%s515_s21] sm:$0xff] (!%p2425_p5)  ;;  %vm660_vm0 = vcmask (!%p2425_p5), 261120  }
  0x72   : > { %s3217_s29 = scalar_lea.vmem %s3559_s6, %s2474_s27  ;;  %s3222_s26 = scalar_lea.vmem %s3560_s7, %s2474_s27  ;;  %661 = vst.msk [vmem:[#allocation2] sm:$0xff] (!%p2425_p5), %vm660_vm0, %v659_v0 }
  0x73   : > { %s3207_s22 = scalar_lea.vmem %s3614_s4, %s2474_s27  ;;  %s3231_s13 = scalar_lea.vmem %s3563_s10, %s2474_s27 }
  0x74   : > { %s3212_s28 = scalar_lea.vmem %s3615_s5, %s2474_s27  ;;  %s2479_s14 = sshll.u32 %s3189_s30, 6 }
  0x75   : > { %s3237_s18 = scalar_lea.vmem %s3564_s11, %s2479_s14  ;;  %658 = sbr.rel (%p2425_p5) target bundleno = 124 (0x7c), region = 80 }
  0x7c PF: > { %v3241_v1 = vld [vmem:[#allocation2] sm:$0xff]  ;;  %vm666_vm1 = vcmask 261120   ;;  %v2927_v9 = vmov 0.0   ;;  %vm2928_vm2 = vmmov 0   ;;  %v2722_v10 = vld [vmem:[%s3207_s22 + $0x8] sm:$0xff]   ;;  %s3617_s17 = scalar_lea.vmem %s3556_s3, %s3189_s30  ;;  %s2930_s27 = smov 120   ;;  %v887_v38 = vlaneseq }
  0x7d   : > { %v667_v2 = vsel %vm666_vm1, %v3241_v1, 0.0  ;;  %v2721_v8 = vld [vmem:[%s3207_s22] sm:$0xff]   ;;  %2520 = vmatprep.subr.bf16.mxu0 %v2927_v9  ;;  %2524 = vmatprep.mubr.msk.bf16.mxu0 %vm2928_vm2, %v2927_v9  ;;  %s3616_s22 = scalar_lea.vmem %s3555_s2, %s3189_s30  ;;  %v2724_v22 = vld [vmem:[%s3212_s28 + $0x8] sm:$0xff]   ;;  %s2931_s0 = smov 112   ;;  %v2932_v36 = vmov 1983009808  }
  0x7e   : > { %668 = vadd.xlane.f32.xlu0 %v667_v2  ;;  %2521 = vmatpush3.bf16.msra.mxu0 %v2721_v8  ;;  %v2426_v15 = vld [vmem:[%s3616_s22] ss:$0 sm:$0xff]  ;;  %v2726_v32 = vld [vmem:[%s3217_s29 + $0x8] sm:$0xff]   ;;  %s3618_s19 = scalar_lea.vmem [#allocation6], %s3173_s12  ;;  %v885_v37 = vunpack.c.l.s4 %v2932_v36  ;;  %v2933_v39 = vmov 1934713408   ;;  %s3619_s4 = scalar_lea.vmem %s3561_s8, %s3189_s30 }
  0x7f   : > { %2544 = vmatprep.subr.bf16.mxu1 %v2927_v9  ;;  %2522 = vmatprep.subr.bf16.mxu0 %v2927_v9  ;;  %v2427_v17 = vld [vmem:[%s3617_s17] ss:$0 sm:$0xff]  ;;  %v917_v40 = vunpack.c.l.s4 %v2933_v39  ;;  %v3293_v42 = vshrl.u32 %v887_v38, 7  ;;  %vm1322_vm3 = vcmask 64512   ;;  %vm1569_vm5 = vcmask 1043456   ;;  %s2936_s23 = smov 24  }
  0x80   : > { %2546 = vmatprep.mubr.msk.bf16.mxu1 %vm2928_vm2, %v2927_v9  ;;  %v2723_v20 = vld [vmem:[%s3212_s28] sm:$0xff]   ;;  %s2929_s28 = smov 104   ;;  %v886_v41 = vunpack.c.0.s8 %v885_v37  ;;  %vm1900_vm6 = vcmask 130048   ;;  %vm1902_vm7 = vcmask 195584   ;;  %p2469_p7 = scmp.ne.s32.totalorder %s2907_s24, 1 }
  0x81   : > { %v2725_v27 = vld [vmem:[%s3217_s29] sm:$0xff]   ;;  %v918_v45 = vunpack.c.0.s8 %v917_v40  ;;  %s2934_s29 = smov 16  }
  0x82   : > { %2523 = vmatpush3.bf16.msra.mxu0 %v2722_v10  ;;  %v663_v34 = vld [vmem:[%s3618_s19] sm:$0xff]  ;;  %v3296_v46 = vsub.s32 %v886_v41, %v3293_v42 }
  0x83   : > { %2528 = vmatprep.subr.bf16.mxu0 %v2927_v9  ;;  %v812_v35 = vpack.c.bf16 %v663_v34, %v663_v34  ;;  %v3299_v52 = vsub.s32 %v918_v45, %v3293_v42 }
 0x10b   : > { %v669_v3 = vpop.xlane.xlu0 %668 }
 0x10c   : > { %v671_v4 = vmul.f32 0.03125, %v669_v3 }
 0x10e   : > { %v672_v5 = vsub.f32 %v3241_v1, %v671_v4 }
 0x110   : > { %v673_v6 = vmul.f32 %v672_v5, %v672_v5 }
 0x112   : > { %v674_v7 = vsel %vm666_vm1, %v673_v6, 0.0 }
 0x113   : > { %675 = vadd.xlane.f32.xlu0 %v674_v7 }
 0x1a0   : > { %v676_v11 = vpop.xlane.xlu0 %675 }
 0x1a1   : > { %v677_v12 = vmul.f32 0.03125, %v676_v11 }
 0x1a3   : > { %v678_v13 = vadd.f32 1e-05, %v677_v12 }
 0x1a5   : > { %2739 = vrsqrt.f32 %v678_v13 }
 0x1af   : > { %v2740_v14 = vpop.eup %2739 }
 0x1b0   : > { %v680_v16 = vmul.f32 %v2740_v14, %v672_v5 }
 0x1b2   : > { %v687_v18 = vmul.f32 %v2426_v15, %v680_v16 }
 0x1b4   : > { %v694_v19 = vadd.f32 %v2427_v17, %v687_v18 }
 0x1b6   : > { %v695_v21 = vpack.c.bf16 %v694_v19, %v694_v19 }
 0x1b8   : > { %2525 = vmatmul.mubr.msk.bf16.vlgmr.msra.gmra.mrb[0].mxu0 %vm666_vm1, %v695_v21 }
 0x1b9   : > { %2529 = vmatpush3.bf16.msra.mxu0 %v2723_v20  ;;  %2532 = vmatprep.mubr.msk.bf16.mxu0 %vm2928_vm2, %v2927_v9 }
 0x1ba   : > { %2530 = vmatprep.subr.bf16.mxu0 %v2927_v9 }
 0x1bd   : > { %2531 = vmatpush3.bf16.msra.mxu0 %v2724_v22 }
 0x1be   : > { %2536 = vmatprep.subr.bf16.mxu0 %v2927_v9 }
 0x1c0   : > { %2533 = vmatmul.mubr.msk.bf16.vlgmr.msra.gmra.mrb[4].mxu0 %vm666_vm1, %v695_v21 }
 0x1c1   : > { %2540 = vmatprep.mubr.msk.bf16.mxu0 %vm2928_vm2, %v2927_v9  ;;  %2537 = vmatpush3.bf16.msra.mxu0 %v2725_v27 }
 0x1c2   : > { %2538 = vmatprep.subr.bf16.mxu0 %v2927_v9 }
 0x1c5   : > { %2539 = vmatpush3.bf16.msra.mxu0 %v2726_v32 }
 0x1c6   : > { %2550 = vmatprep.subr.bf16.mxu0 %v2927_v9 }
 0x1c8   : > { %2541 = vmatmul.mubr.msk.bf16.vlgmr.msra.gmra.mrb[8].mxu0 %vm666_vm1, %v812_v35 }
 0x1c9   : > { %2552 = vmatprep.mubr.msk.bf16.mxu0 %vm2928_vm2, %v2927_v9 }
 0x28b   : > { %v749_v23 = vpop.f32.mrb[0].mxu0 }
 0x28c   : > { %v2526_v24 = vpop.f32.mrb[1].mxu0  ;;  %v755_v33 = vmul.f32 0.35355338, %v749_v23 }
 0x28d   : > { %v752_v25 = vpop.f32.mrb[2].mxu0 }
 0x28e   : > { %v2527_v26 = vpop.f32.mrb[3].mxu0 }
 0x293   : > { %v806_v28 = vpop.f32.mrb[4].mxu0 }
 0x294   : > { %1029 = vrot.lane.b32.xlu0 %v806_v28, %s2929_s28  ;;  %1023 = vrot.lane.b32.xlu1 %v806_v28, %s2930_s27  ;;  %v2534_v29 = vpop.f32.mrb[5].mxu0 }
 0x295   : > { %v809_v30 = vpop.f32.mrb[6].mxu0 }
 0x296   : > { %v2535_v31 = vpop.f32.mrb[7].mxu0 }
 0x298   : > { %1026 = vrot.lane.b32.xlu1 %v806_v28, %s2931_s0 }
 0x29c   : > { %873 = vrot.lane.b32.xlu1 %v755_v33, %s2930_s27 }
 0x2a0   : > { %876 = vrot.lane.b32.xlu1 %v755_v33, %s2931_s0 }
 0x2a4   : > { %879 = vrot.lane.b32.xlu1 %v755_v33, %s2929_s28 }
 0x306   : > { %v1030_v43 = vpop.permute.xlu0 %1029  ;;  %v1024_v44 = vpop.permute.xlu1 %1023 }
 0x307   : > { %v1048_v47 = vcombine.low %v1024_v44, %v1030_v43  ;;  %v1049_v48 = vcombine.high %v1024_v44, %v1030_v43 }
 0x309   : > { %v1056_v53 = vrot.slane %v1048_v47, %v3296_v46  ;;  %v1063_v54 = vrot.slane %v1049_v48, %v3296_v46 }
 0x30a   : > { %v1027_v49 = vpop.permute.xlu1 %1026 }
 0x30b   : > { %v1032_v50 = vcombine.low %v806_v28, %v1027_v49  ;;  %v1033_v51 = vcombine.high %v806_v28, %v1027_v49 }
 0x30d   : > { %v1040_v55 = vrot.slane %v1032_v50, %v3296_v46  ;;  %v1047_v56 = vrot.slane %v1033_v51, %v3296_v46 }
 0x30e   : > { %v874_v57 = vpop.permute.xlu1 %873 }
 0x30f   : > { %v1064_v58 = vcombine.low %v1040_v55, %v1056_v53  ;;  %v1065_v59 = vcombine.high %v1040_v55, %v1056_v53  ;;  %v1080_v60 = vcombine.low %v1047_v56, %v1063_v54  ;;  %v1081_v61 = vcombine.high %v1047_v56, %v1063_v54 }
 0x311   : > { %v1072_v62 = vrot.slane %v1064_v58, %v3299_v52  ;;  %v1079_v63 = vrot.slane %v1065_v59, %v3299_v52  ;;  %v1088_v0 = vrot.slane %v1080_v60, %v3299_v52  ;;  %v1095_v2 = vrot.slane %v1081_v61, %v3299_v52 }
 0x312   : > { %v877_v3 = vpop.permute.xlu1 %876 }
 0x313   : > { %v1100_v4 = vcombine.low %v1072_v62, %v1079_v63  ;;  %v2439_v5 = vcombine.high %v1072_v62, %v1079_v63  ;;  %v1116_v6 = vcombine.low %v1088_v0, %v1095_v2  ;;  %v2440_v7 = vcombine.high %v1088_v0, %v1095_v2 }
 0x314   : > { %v882_v8 = vcombine.low %v755_v33, %v877_v3  ;;  %v883_v10 = vcombine.high %v755_v33, %v877_v3 }
 0x315   : > { %v1107_v11 = vrot.slane %v1100_v4, %v3296_v46  ;;  %v1115_v12 = vrot.slane %v2439_v5, %v3296_v46  ;;  %v1123_v13 = vrot.slane %v1116_v6, %v3296_v46  ;;  %v1131_v14 = vrot.slane %v2440_v7, %v3296_v46 }
 0x316   : > { %v880_v15 = vpop.permute.xlu1 %879  ;;  %v890_v20 = vrot.slane %v882_v8, %v3296_v46  ;;  %v897_v21 = vrot.slane %v883_v10, %v3296_v46 }
 0x317   : > { %v898_v16 = vcombine.low %v874_v57, %v880_v15  ;;  %v899_v17 = vcombine.high %v874_v57, %v880_v15  ;;  %v1132_v18 = vcombine.low %v1107_v11, %v1115_v12  ;;  %v1148_v19 = vcombine.low %v1123_v13, %v1131_v14 }
 0x318   : > { %v1133_v26 = vcombine.high %v1107_v11, %v1115_v12  ;;  %v1149_v27 = vcombine.high %v1123_v13, %v1131_v14 }
 0x319   : > { %v906_v22 = vrot.slane %v898_v16, %v3296_v46  ;;  %v913_v23 = vrot.slane %v899_v17, %v3296_v46  ;;  %v1140_v24 = vrot.slane %v1132_v18, %v3299_v52  ;;  %v1156_v25 = vrot.slane %v1148_v19, %v3299_v52  ;;  %v3353_v16 = vpop.f32.mrb[8].mxu0 }
 0x31a   : > { %v1147_v41 = vrot.slane %v1133_v26, %v3299_v52  ;;  %v1163_v43 = vrot.slane %v1149_v27, %v3299_v52  ;;  %v2542_v17 = vpop.f32.mrb[9].mxu0 }
 0x31b   : > { %v914_v28 = vcombine.low %v890_v20, %v906_v22  ;;  %v915_v29 = vcombine.high %v890_v20, %v906_v22  ;;  %v930_v30 = vcombine.low %v897_v21, %v913_v23  ;;  %v931_v31 = vcombine.high %v897_v21, %v913_v23  ;;  %v869_v18 = vpop.f32.mrb[10].mxu0 }
 0x31c   : > { %v1164_v32 = vcombine.low %v1140_v24, %v1156_v25  ;;  %v1165_v33 = vcombine.high %v1140_v24, %v1156_v25  ;;  %v1166_v58 = vcombine.low %v1147_v41, %v1163_v43  ;;  %v1167_v59 = vcombine.high %v1147_v41, %v1163_v43  ;;  %v2543_v19 = vpop.f32.mrb[11].mxu0 }
 0x31d   : > { %v922_v34 = vrot.slane %v914_v28, %v3299_v52  ;;  %v929_v35 = vrot.slane %v915_v29, %v3299_v52  ;;  %v938_v36 = vrot.slane %v930_v30, %v3299_v52  ;;  %v945_v37 = vrot.slane %v931_v31, %v3299_v52 }
 0x31e   : > { %v1168_v39 = vpack.c.bf16 %v1164_v32, %v1164_v32  ;;  %v1169_v40 = vpack.c.bf16 %v1165_v33, %v1165_v33  ;;  %v1170_v3 = vpack.c.bf16 %v1166_v58, %v1166_v58  ;;  %v1171_v4 = vpack.c.bf16 %v1167_v59, %v1167_v59 }
 0x31f   : > { %v950_v44 = vcombine.low %v922_v34, %v929_v35  ;;  %v2437_v45 = vcombine.high %v922_v34, %v929_v35  ;;  %v966_v47 = vcombine.low %v938_v36, %v945_v37  ;;  %v2438_v48 = vcombine.high %v938_v36, %v945_v37 }
 0x320   : > { %v1327_v49 = vsel %vm1322_vm3, %v1168_v39, 0  ;;  %v1373_v50 = vsel %vm1322_vm3, %v1169_v40, 0  ;;  %v1419_v10 = vsel %vm1322_vm3, %v1170_v3, 0  ;;  %v1465_v11 = vsel %vm1322_vm3, %v1171_v4, 0 }
 0x321   : > { %v957_v51 = vrot.slane %v950_v44, %v3296_v46  ;;  %v965_v53 = vrot.slane %v2437_v45, %v3296_v46  ;;  %v973_v54 = vrot.slane %v966_v47, %v3296_v46  ;;  %v981_v55 = vrot.slane %v2438_v48, %v3296_v46  ;;  %2545 = vmatpush3.bf16.xpose.msra.mxu1 %v1327_v49 }
 0x322   : > { %2551 = vmatpush3.bf16.xpose.msra.mxu0 %v1373_v50  ;;  %2556 = vmatprep.subr.bf16.mxu1 %v2927_v9  ;;  %v1510_v20 = vand.u32 127, %v887_v38 }
 0x323   : > { %2562 = vmatprep.subr.bf16.mxu0 %v2927_v9  ;;  %v982_v56 = vcombine.low %v957_v51, %v965_v53  ;;  %v998_v57 = vcombine.low %v973_v54, %v981_v55  ;;  %v983_v60 = vcombine.high %v957_v51, %v965_v53  ;;  %v999_v61 = vcombine.high %v973_v54, %v981_v55 }
 0x324   : > { %vm1511_vm4 = vcmp.le.s32.totalorder %v1510_v20, %v3293_v42 }
 0x325   : > { %v990_v62 = vrot.slane %v982_v56, %v3299_v52  ;;  %v1006_v63 = vrot.slane %v998_v57, %v3299_v52  ;;  %v997_v7 = vrot.slane %v983_v60, %v3299_v52  ;;  %v1013_v8 = vrot.slane %v999_v61, %v3299_v52 }
 0x327   : > { %v1014_v0 = vcombine.low %v990_v62, %v1006_v63  ;;  %v1015_v2 = vcombine.high %v990_v62, %v1006_v63  ;;  %v1016_v12 = vcombine.low %v997_v7, %v1013_v8  ;;  %v1017_v13 = vcombine.high %v997_v7, %v1013_v8 }
 0x329   : > { %v1018_v5 = vpack.c.bf16 %v1014_v0, %v1014_v0  ;;  %v1019_v6 = vpack.c.bf16 %v1015_v2, %v1015_v2  ;;  %v1020_v14 = vpack.c.bf16 %v1016_v12, %v1016_v12  ;;  %v1021_v15 = vpack.c.bf16 %v1017_v13, %v1017_v13 }
 0x32b   : > { %2547 = vmatmul.mubr.msk.bf16.vlgmr.msra.gmra.mrb[0].mxu1 %vm1322_vm3, %v1018_v5  ;;  %2553 = vmatmul.mubr.msk.bf16.vlgmr.msra.gmra.mrb[12].mxu0 %vm1322_vm3, %v1019_v6 }
 0x32c   : > { %2557 = vmatpush3.bf16.xpose.msra.mxu1 %v1419_v10  ;;  %2563 = vmatpush3.bf16.xpose.msra.mxu0 %v1465_v11 }
 0x32d   : > { %2558 = vmatprep.mubr.msk.bf16.mxu1 %vm2928_vm2, %v2927_v9  ;;  %2564 = vmatprep.mubr.msk.bf16.mxu0 %vm2928_vm2, %v2927_v9 }
 0x32e   : > { %2568 = vmatprep.subr.bf16.mxu1 %v2927_v9  ;;  %2574 = vmatprep.subr.bf16.mxu0 %v2927_v9 }
 0x333   : > { %2559 = vmatmul.mubr.msk.bf16.vlgmr.msra.gmra.mrb[4].mxu1 %vm1322_vm3, %v1020_v14  ;;  %2565 = vmatmul.mubr.msk.bf16.vlgmr.msra.gmra.mrb[16].mxu0 %vm1322_vm3, %v1021_v15 }
 0x334   : > { %2570 = vmatprep.mubr.msk.bf16.mxu1 %vm2928_vm2, %v2927_v9  ;;  %2576 = vmatprep.mubr.msk.bf16.mxu0 %vm2928_vm2, %v2927_v9 }
 0x3fe   : > { %v1363_v21 = vpop.f32.mrb[0].mxu1  ;;  %v1409_v22 = vpop.f32.mrb[12].mxu0 }
 0x3ff   : > { %v1514_v23 = vsel %vm1511_vm4, %v1363_v21, -inf  ;;  %v1515_v24 = vsel %vm1511_vm4, %v1409_v22, -inf  ;;  %v2548_v25 = vpop.f32.mrb[1].mxu1  ;;  %v2554_v26 = vpop.f32.mrb[13].mxu0 }
 0x400   : > { %v1366_v27 = vpop.f32.mrb[2].mxu1  ;;  %v1412_v28 = vpop.f32.mrb[14].mxu0  ;;  %v1518_v29 = vsel %vm1322_vm3, %v1514_v23, -inf  ;;  %v1521_v30 = vsel %vm1322_vm3, %v1515_v24, -inf }
 0x401   : > { %1519 = vmax.xlane.f32.xlu1 %v1518_v29  ;;  %v2549_v38 = vpop.f32.mrb[3].mxu1  ;;  %1522 = vmax.xlane.f32.xlu0 %v1521_v30  ;;  %v2555_v31 = vpop.f32.mrb[15].mxu0 }
 0x406   : > { %v1455_v32 = vpop.f32.mrb[4].mxu1  ;;  %v1501_v33 = vpop.f32.mrb[16].mxu0 }
 0x407   : > { %v1516_v34 = vsel %vm1511_vm4, %v1455_v32, -inf  ;;  %v2560_v35 = vpop.f32.mrb[5].mxu1  ;;  %v2566_v36 = vpop.f32.mrb[17].mxu0  ;;  %v1517_v41 = vsel %vm1511_vm4, %v1501_v33, -inf }
 0x408   : > { %v1458_v37 = vpop.f32.mrb[6].mxu1  ;;  %v1504_v39 = vpop.f32.mrb[18].mxu0  ;;  %v1524_v40 = vsel %vm1322_vm3, %v1516_v34, -inf  ;;  %v1527_v45 = vsel %vm1322_vm3, %v1517_v41, -inf }
 0x409   : > { %1525 = vmax.xlane.f32.xlu1 %v1524_v40  ;;  %v2561_v43 = vpop.f32.mrb[7].mxu1  ;;  %v2567_v44 = vpop.f32.mrb[19].mxu0 }
 0x40d   : > { %1528 = vmax.xlane.f32.xlu1 %v1527_v45 }
 0x41e   : > { %1176 = vrot.lane.b32.xlu1 %v3353_v16, %s2931_s0 }
 0x48e   : > { %v1520_v47 = vpop.xlane.xlu1 %1519  ;;  %v1523_v48 = vpop.xlane.xlu0 %1522 }
 0x48f   : > { %v1530_v49 = vsub.f32 %v1514_v23, %v1520_v47  ;;  %v1531_v50 = vsub.f32 %v1515_v24, %v1523_v48 }
 0x491   : > { %v1534_v51 = vmul.f32 1.442695, %v1530_v49  ;;  %v1536_v53 = vmul.f32 1.442695, %v1531_v50 }
 0x493   : > { %2741 = vpow2.f32 %v1534_v51 }
 0x494   : > { %2743 = vpow2.f32 %v1536_v53 }
 0x496   : > { %v1526_v57 = vpop.xlane.xlu1 %1525 }
 0x497   : > { %v1532_v59 = vsub.f32 %v1516_v34, %v1526_v57 }
 0x499   : > { %v1538_v61 = vmul.f32 1.442695, %v1532_v59 }
 0x49a   : > { %v1529_v58 = vpop.xlane.xlu1 %1528 }
 0x49b   : > { %v1533_v60 = vsub.f32 %v1517_v41, %v1529_v58  ;;  %2745 = vpow2.f32 %v1538_v61 }
 0x49d   : > { %v3371_v54 = vpop.eup %2741  ;;  %v1540_v62 = vmul.f32 1.442695, %v1533_v60 }
 0x49e   : > { %v3373_v42 = vpop.eup %2743  ;;  %v1542_v55 = vsel %vm1322_vm3, %v3371_v54, 0.0  ;;  %v1177_v4 = vpop.permute.xlu1 %1176 }
 0x49f   : > { %1543 = vadd.xlane.f32.xlu0 %v1542_v55  ;;  %v1545_v56 = vsel %vm1322_vm3, %v3373_v42, 0.0  ;;  %2747 = vpow2.f32 %v1540_v62  ;;  %v1182_v7 = vcombine.low %v3353_v16, %v1177_v4  ;;  %v1183_v8 = vcombine.high %v3353_v16, %v1177_v4 }
 0x4a0   : > { %1546 = vadd.xlane.f32.xlu1 %v1545_v56 }
 0x4a1   : > { %v1190_v14 = vrot.slane %v1182_v7, %v3296_v46  ;;  %v1197_v15 = vrot.slane %v1183_v8, %v3296_v46 }
 0x4a5   : > { %v3383_v63 = vpop.eup %2745 }
 0x4a6   : > { %v1548_v2 = vsel %vm1322_vm3, %v3383_v63, 0.0 }
 0x4a9   : > { %v3385_v0 = vpop.eup %2747 }
 0x4aa   : > { %v1551_v3 = vsel %vm1322_vm3, %v3385_v0, 0.0 }
 0x4b1   : > { %1179 = vrot.lane.b32.xlu1 %v3353_v16, %s2929_s28 }
 0x4b5   : > { %1173 = vrot.lane.b32.xlu0 %v3353_v16, %s2930_s27 }
 0x4d4   : > { %1549 = vadd.xlane.f32.xlu0 %v1548_v2 }
 0x4d5   : > { %1552 = vadd.xlane.f32.xlu1 %v1551_v3 }
 0x52c   : > { %v1544_v5 = vpop.xlane.xlu0 %1543 }
 0x52d   : > { %v1547_v6 = vpop.xlane.xlu1 %1546  ;;  %2749 = vrcp.f32 %v1544_v5 }
 0x52e   : > { %2751 = vrcp.f32 %v1547_v6 }
 0x530   : > { %v1174_v10 = vpop.permute.xlu0 %1173 }
 0x531   : > { %v1180_v11 = vpop.permute.xlu1 %1179 }
 0x532   : > { %v1198_v12 = vcombine.low %v1174_v10, %v1180_v11  ;;  %v1199_v13 = vcombine.high %v1174_v10, %v1180_v11  ;;  %v2727_v10 = vld [vmem:[%s3222_s26] sm:$0xff]  }
 0x534   : > { %v1206_v17 = vrot.slane %v1198_v12, %v3296_v46  ;;  %v1213_v18 = vrot.slane %v1199_v13, %v3296_v46 }
 0x536   : > { %v1214_v19 = vcombine.low %v1190_v14, %v1206_v17  ;;  %v1215_v20 = vcombine.high %v1190_v14, %v1206_v17  ;;  %v1230_v21 = vcombine.low %v1197_v15, %v1213_v18  ;;  %v1231_v22 = vcombine.high %v1197_v15, %v1213_v18 }
 0x537   : > { %v2750_v40 = vpop.eup %2749 }
 0x538   : > { %v1222_v16 = vrot.slane %v1214_v19, %v3299_v52  ;;  %v1229_v23 = vrot.slane %v1215_v20, %v3299_v52  ;;  %v1238_v24 = vrot.slane %v1230_v21, %v3299_v52  ;;  %v1245_v25 = vrot.slane %v1231_v22, %v3299_v52  ;;  %v2752_v44 = vpop.eup %2751 }
 0x539   : > { %v1558_v50 = vmul.f32 %v2750_v40, %v3371_v54  ;;  %v1559_v51 = vmul.f32 %v2752_v44, %v3373_v42 }
 0x53a   : > { %v1250_v26 = vcombine.low %v1222_v16, %v1229_v23  ;;  %v2441_v27 = vcombine.high %v1222_v16, %v1229_v23  ;;  %v1266_v28 = vcombine.low %v1238_v24, %v1245_v25  ;;  %v2442_v29 = vcombine.high %v1238_v24, %v1245_v25 }
 0x53b   : > { %v1562_v60 = vpack.c.bf16 %v1558_v50, %v1558_v50  ;;  %v1563_v61 = vpack.c.bf16 %v1559_v51, %v1559_v51 }
 0x53c   : > { %v1257_v30 = vrot.slane %v1250_v26, %v3296_v46  ;;  %v1265_v38 = vrot.slane %v2441_v27, %v3296_v46  ;;  %v1273_v31 = vrot.slane %v1266_v28, %v3296_v46  ;;  %v1281_v32 = vrot.slane %v2442_v29, %v3296_v46 }
 0x53e   : > { %v1282_v33 = vcombine.low %v1257_v30, %v1265_v38  ;;  %v1283_v34 = vcombine.high %v1257_v30, %v1265_v38  ;;  %v1298_v35 = vcombine.low %v1273_v31, %v1281_v32  ;;  %v1299_v36 = vcombine.high %v1273_v31, %v1281_v32 }
 0x540   : > { %v1290_v37 = vrot.slane %v1282_v33, %v3299_v52  ;;  %v1297_v39 = vrot.slane %v1283_v34, %v3299_v52  ;;  %v1306_v41 = vrot.slane %v1298_v35, %v3299_v52  ;;  %v1313_v43 = vrot.slane %v1299_v36, %v3299_v52  ;;  %v2728_v36 = vld [vmem:[%s3222_s26 + $0x8] sm:$0xff]   ;;  %s2935_s26 = smov 8  }
 0x542   : > { %v1314_v45 = vcombine.low %v1290_v37, %v1306_v41  ;;  %v1315_v47 = vcombine.high %v1290_v37, %v1306_v41  ;;  %v1316_v48 = vcombine.low %v1297_v39, %v1313_v43  ;;  %v1317_v49 = vcombine.high %v1297_v39, %v1313_v43 }
 0x544   : > { %v1318_v53 = vpack.c.bf16 %v1314_v45, %v1314_v45  ;;  %v1319_v55 = vpack.c.bf16 %v1315_v47, %v1315_v47  ;;  %v1320_v58 = vpack.c.bf16 %v1316_v48, %v1316_v48  ;;  %v1321_v59 = vpack.c.bf16 %v1317_v49, %v1317_v49 }
 0x546   : > { %v1571_v56 = vsel %vm1569_vm5, %v1318_v53, 0  ;;  %v1617_v57 = vsel %vm1569_vm5, %v1319_v55, 0  ;;  %v1663_v54 = vsel %vm1569_vm5, %v1320_v58, 0  ;;  %v1709_v42 = vsel %vm1569_vm5, %v1321_v59, 0 }
 0x547   : > { %2569 = vmatpush3.bf16.msra.mxu1 %v1571_v56  ;;  %2575 = vmatpush3.bf16.msra.mxu0 %v1617_v57 }
 0x548   : > { %2580 = vmatprep.subr.bf16.mxu1 %v2927_v9  ;;  %2586 = vmatprep.subr.bf16.mxu0 %v2927_v9 }
 0x54a   : > { %2571 = vmatmul.mubr.msk.bf16.vlgmr.msra.gmra.mrb[8].mxu1 %vm1322_vm3, %v1562_v60  ;;  %2577 = vmatmul.mubr.msk.bf16.vlgmr.msra.gmra.mrb[20].mxu0 %vm1322_vm3, %v1563_v61 }
 0x54b   : > { %2581 = vmatpush3.bf16.msra.mxu1 %v1663_v54  ;;  %2587 = vmatpush3.bf16.msra.mxu0 %v1709_v42 }
 0x54c   : > { %2582 = vmatprep.mubr.msk.bf16.mxu1 %vm2928_vm2, %v2927_v9  ;;  %2588 = vmatprep.mubr.msk.bf16.mxu0 %vm2928_vm2, %v2927_v9 }
 0x54d   : > { %2592 = vmatprep.subr.bf16.mxu1 %v2927_v9  ;;  %2600 = vmatprep.subr.bf16.mxu0 %v2927_v9 }
 0x561   : > { %v1550_v62 = vpop.xlane.xlu0 %1549 }
 0x562   : > { %2753 = vrcp.f32 %v1550_v62  ;;  %v1553_v2 = vpop.xlane.xlu1 %1552 }
 0x563   : > { %2755 = vrcp.f32 %v1553_v2 }
 0x56c   : > { %v2754_v3 = vpop.eup %2753 }
 0x56d   : > { %v2756_v4 = vpop.eup %2755  ;;  %v1560_v5 = vmul.f32 %v2754_v3, %v3383_v63 }
 0x56e   : > { %v1561_v6 = vmul.f32 %v2756_v4, %v3385_v0 }
 0x56f   : > { %v1564_v7 = vpack.c.bf16 %v1560_v5, %v1560_v5 }
 0x570   : > { %v1565_v8 = vpack.c.bf16 %v1561_v6, %v1561_v6 }
 0x571   : > { %2583 = vmatmul.mubr.msk.bf16.vlgmr.msra.gmra.mrb[12].mxu1 %vm1322_vm3, %v1564_v7 }
 0x572   : > { %2589 = vmatmul.mubr.msk.bf16.vlgmr.msra.gmra.mrb[24].mxu0 %vm1322_vm3, %v1565_v8  ;;  %2596 = vmatprep.mubr.msk.bf16.mxu1 %vm2928_vm2, %v2927_v9 }
 0x573   : > { %2604 = vmatprep.mubr.msk.bf16.mxu0 %vm2928_vm2, %v2927_v9  ;;  %2593 = vmatpush3.bf16.msra.mxu1 %v2727_v10 }
 0x574   : > { %2594 = vmatprep.subr.bf16.mxu1 %v2927_v9 }
 0x577   : > { %2595 = vmatpush3.bf16.msra.mxu1 %v2728_v36 }
 0x578   : > { %2608 = vmatprep.subr.bf16.mxu1 %v2927_v9 }
 0x61d   : > { %v1607_v11 = vpop.f32.mrb[8].mxu1  ;;  %v1653_v63 = vpop.f32.mrb[20].mxu0 }
 0x61e   : > { %v2572_v12 = vpop.f32.mrb[9].mxu1  ;;  %v2578_v0 = vpop.f32.mrb[21].mxu0 }
 0x61f   : > { %v1610_v13 = vpop.f32.mrb[10].mxu1  ;;  %v1656_v14 = vpop.f32.mrb[22].mxu0 }
 0x620   : > { %v2573_v15 = vpop.f32.mrb[11].mxu1  ;;  %v2579_v17 = vpop.f32.mrb[23].mxu0 }
 0x644   : > { %v1699_v18 = vpop.f32.mrb[12].mxu1 }
 0x645   : > { %v1751_v19 = vcombine.low %v1607_v11, %v1699_v18  ;;  %v1752_v20 = vcombine.high %v1607_v11, %v1699_v18  ;;  %v1745_v21 = vpop.f32.mrb[24].mxu0  ;;  %v2584_v22 = vpop.f32.mrb[13].mxu1 }
 0x646   : > { %v1767_v16 = vcombine.low %v1653_v63, %v1745_v21  ;;  %v1768_v23 = vcombine.high %v1653_v63, %v1745_v21  ;;  %v2590_v24 = vpop.f32.mrb[25].mxu0  ;;  %v1702_v25 = vpop.f32.mrb[14].mxu1 }
 0x647   : > { %v1759_v26 = vrot.slane %v1751_v19, %v3296_v46  ;;  %v1766_v27 = vrot.slane %v1752_v20, %v3296_v46  ;;  %v1748_v28 = vpop.f32.mrb[26].mxu0  ;;  %v2585_v29 = vpop.f32.mrb[15].mxu1  ;;  %v2730_v19 = vld [vmem:[%s3231_s13 + $0x8] sm:$0xff]   ;;  %v2731_v20 = vld [vmem:[%s3237_s18] sm:$0xff]  }
 0x648   : > { %v1775_v30 = vrot.slane %v1767_v16, %v3296_v46  ;;  %v1782_v38 = vrot.slane %v1768_v23, %v3296_v46  ;;  %v2591_v31 = vpop.f32.mrb[27].mxu0  ;;  %v2456_v24 = vld [vmem:[%s3619_s4] ss:$0 sm:$0xff] }
 0x649   : > { %v2734_v31 = vld [vmem:[%s3237_s18 + $0x18] sm:$0xff]  }
 0x64a   : > { %v1783_v32 = vcombine.low %v1759_v26, %v1775_v30  ;;  %v1784_v33 = vcombine.high %v1759_v26, %v1775_v30  ;;  %v1799_v34 = vcombine.low %v1766_v27, %v1782_v38  ;;  %v1800_v35 = vcombine.high %v1766_v27, %v1782_v38  ;;  %v2457_v26 = vld [vmem:[%s643_s1] ss:$0 sm:$0xff]  ;;  %v2732_v30 = vld [vmem:[%s3237_s18 + $0x8] sm:$0xff]   ;;  %v2733_v38 = vld [vmem:[%s3237_s18 + $0x10] sm:$0xff]  }
 0x64c   : > { %v1791_v37 = vrot.slane %v1783_v32, %v3299_v52  ;;  %v1798_v39 = vrot.slane %v1784_v33, %v3299_v52  ;;  %v1807_v40 = vrot.slane %v1799_v34, %v3299_v52  ;;  %v1814_v41 = vrot.slane %v1800_v35, %v3299_v52  ;;  %v2735_v32 = vld [vmem:[%s3237_s18 + $0x20] sm:$0xff]   ;;  %v2736_v33 = vld [vmem:[%s3237_s18 + $0x28] sm:$0xff]   ;;  %v2737_v34 = vld [vmem:[%s3237_s18 + $0x30] sm:$0xff]  }
 0x64d   : > { %v2738_v35 = vld [vmem:[%s3237_s18 + $0x38] sm:$0xff]  }
 0x64e   : > { %v1819_v43 = vcombine.low %v1791_v37, %v1798_v39  ;;  %v2451_v44 = vcombine.high %v1791_v37, %v1798_v39  ;;  %v1835_v45 = vcombine.low %v1807_v40, %v1814_v41  ;;  %v2452_v47 = vcombine.high %v1807_v40, %v1814_v41 }
 0x650   : > { %v1826_v48 = vrot.slane %v1819_v43, %v3296_v46  ;;  %v1834_v49 = vrot.slane %v2451_v44, %v3296_v46  ;;  %v1842_v50 = vrot.slane %v1835_v45, %v3296_v46  ;;  %v1850_v51 = vrot.slane %v2452_v47, %v3296_v46 }
 0x652   : > { %v1852_v53 = vcombine.high %v1826_v48, %v1834_v49  ;;  %v1868_v55 = vcombine.high %v1842_v50, %v1850_v51  ;;  %v1851_v56 = vcombine.low %v1826_v48, %v1834_v49  ;;  %v1867_v57 = vcombine.low %v1842_v50, %v1850_v51 }
 0x654   : > { %v1866_v58 = vrot.slane %v1852_v53, %v3299_v52  ;;  %v1882_v59 = vrot.slane %v1868_v55, %v3299_v52  ;;  %v1859_v60 = vrot.slane %v1851_v56, %v3299_v52  ;;  %v1875_v61 = vrot.slane %v1867_v57, %v3299_v52 }
 0x656   : > { %v1885_v54 = vcombine.low %v1866_v58, %v1882_v59  ;;  %v1884_v42 = vcombine.high %v1859_v60, %v1875_v61  ;;  %v1886_v62 = vcombine.high %v1866_v58, %v1882_v59  ;;  %v1883_v2 = vcombine.low %v1859_v60, %v1875_v61 }
 0x658   : > { %1892 = vrot.lane.b32.xlu1 %v1885_v54, %s2934_s29  ;;  %1888 = vrot.lane.b32.xlu0 %v1884_v42, %s2935_s26 }
 0x65c   : > { %1896 = vrot.lane.b32.xlu0 %v1886_v62, %s2936_s23 }
 0x6ca   : > { %v1889_v46 = vpop.permute.xlu0 %1888  ;;  %v1893_v3 = vpop.permute.xlu1 %1892 }
 0x6cb   : > { %v1899_v4 = vsel %vm1322_vm3, %v1883_v2, %v1889_v46 }
 0x6cc   : > { %v1901_v6 = vsel %vm1900_vm6, %v1899_v4, %v1893_v3 }
 0x6ce   : > { %v1897_v5 = vpop.permute.xlu0 %1896 }
 0x6cf   : > { %v1903_v7 = vsel %vm1902_vm7, %v1901_v6, %v1897_v5 }
 0x6d0   : > { %v1904_v52 = vpack.c.bf16 %v1903_v7, %v1903_v7 }
 0x6d2   : > { %2597 = vmatmul.mubr.msk.bf16.vlgmr.msra.gmra.mrb[16].mxu1 %vm666_vm1, %v1904_v52 }
 0x6d3   : > { %2624 = vmatprep.mubr.msk.bf16.mxu1 %vm2928_vm2, %v2927_v9  ;;  %2609 = vmatpush3.bf16.msra.mxu1 %v2731_v20 }
 0x6d4   : > { %2610 = vmatprep.subr.bf16.mxu1 %v2927_v9 }
 0x6d7   : > { %2611 = vmatpush3.bf16.msra.mxu1 %v2732_v30 }
 0x6d8   : > { %2612 = vmatprep.subr.bf16.mxu1 %v2927_v9 }
 0x6db   : > { %2613 = vmatpush3.bf16.msra.mxu1 %v2733_v38 }
 0x6dc   : > { %2614 = vmatprep.subr.bf16.mxu1 %v2927_v9 }
 0x6df   : > { %2615 = vmatpush3.bf16.msra.mxu1 %v2734_v31 }
 0x6e0   : > { %2616 = vmatprep.subr.bf16.mxu1 %v2927_v9 }
 0x6e3   : > { %2617 = vmatpush3.bf16.msra.mxu1 %v2735_v32 }
 0x6e4   : > { %2618 = vmatprep.subr.bf16.mxu1 %v2927_v9 }
 0x6e7   : > { %2619 = vmatpush3.bf16.msra.mxu1 %v2736_v33 }
 0x6e8   : > { %2620 = vmatprep.subr.bf16.mxu1 %v2927_v9 }
 0x6eb   : > { %2621 = vmatpush3.bf16.msra.mxu1 %v2737_v34 }
 0x6ec   : > { %2622 = vmatprep.subr.bf16.mxu1 %v2927_v9 }
 0x6ef   : > { %2623 = vmatpush3.bf16.msra.mxu1 %v2738_v35 }
 0x7a5   : > { %v1958_v8 = vpop.f32.mrb[16].mxu1 }
 0x7a6   : > { %v3458_v10 = vadd.f32 %v1958_v8, %v3241_v1  ;;  %v2598_v11 = vpop.f32.mrb[17].mxu1  ;;  %v2729_v1 = vld [vmem:[%s3231_s13] sm:$0xff]  }
 0x7a7   : > { %v1961_v63 = vpop.f32.mrb[18].mxu1  ;;  %2601 = vmatpush3.bf16.msra.mxu0 %v2729_v1 }
 0x7a8   : > { %v2599_v12 = vpop.f32.mrb[19].mxu1  ;;  %v1967_v0 = vsel %vm666_vm1, %v3458_v10, 0.0  ;;  %2602 = vmatprep.subr.bf16.mxu0 %v2927_v9 }
 0x7a9   : > { %1968 = vadd.xlane.f32.xlu1 %v1967_v0 }
 0x7ab   : > { %2603 = vmatpush3.bf16.msra.mxu0 %v2730_v19 }
 0x836   : > { %v1969_v13 = vpop.xlane.xlu1 %1968 }
 0x837   : > { %v1970_v14 = vmul.f32 0.03125, %v1969_v13 }
 0x839   : > { %v1971_v15 = vsub.f32 %v3458_v10, %v1970_v14 }
 0x83b   : > { %v1972_v17 = vmul.f32 %v1971_v15, %v1971_v15 }
 0x83d   : > { %v1973_v18 = vsel %vm666_vm1, %v1972_v17, 0.0 }
 0x83e   : > { %1974 = vadd.xlane.f32.xlu0 %v1973_v18 }
 0x8cb   : > { %v1975_v21 = vpop.xlane.xlu0 %1974 }
 0x8cc   : > { %v1976_v22 = vmul.f32 0.03125, %v1975_v21 }
 0x8ce   : > { %v1977_v16 = vadd.f32 1e-05, %v1976_v22 }
 0x8d0   : > { %2757 = vrsqrt.f32 %v1977_v16 }
 0x8da   : > { %v2758_v23 = vpop.eup %2757 }
 0x8db   : > { %v1979_v25 = vmul.f32 %v2758_v23, %v1971_v15 }
 0x8dd   : > { %v1986_v27 = vmul.f32 %v2456_v24, %v1979_v25 }
 0x8df   : > { %v1993_v28 = vadd.f32 %v2457_v26, %v1986_v27 }
 0x8e1   : > { %v1994_v29 = vpack.c.bf16 %v1993_v28, %v1993_v28 }
 0x8e3   : > { %2605 = vmatmul.mubr.msk.bf16.vlgmr.msra.gmra.mrb[28].mxu0 %vm666_vm1, %v1994_v29 }
 0x9b6   : > { %v2048_v36 = vpop.f32.mrb[28].mxu0 }
 0x9b7   : > { %v2055_v37 = vmul.f32 0.044715, %v2048_v36  ;;  %v2606_v39 = vpop.f32.mrb[29].mxu0  ;;  %v2054_v49 = vmul.f32 0.5, %v2048_v36 }
 0x9b8   : > { %v2051_v40 = vpop.f32.mrb[30].mxu0 }
 0x9b9   : > { %v2056_v41 = vmul.f32 %v2055_v37, %v2048_v36  ;;  %v2607_v43 = vpop.f32.mrb[31].mxu0 }
 0x9bb   : > { %v2057_v44 = vmul.f32 %v2056_v41, %v2048_v36 }
 0x9bd   : > { %v2058_v45 = vadd.f32 %v2057_v44, %v2048_v36 }
 0x9bf   : > { %v2059_v47 = vmul.f32 0.7978846, %v2058_v45 }
 0x9c1   : > { %2759 = vtanh.f32 %v2059_v47 }
 0x9cb   : > { %v2760_v48 = vpop.eup %2759 }
 0x9cc   : > { %v2061_v50 = vadd.f32 1.0, %v2760_v48 }
 0x9ce   : > { %v2062_v51 = vmul.f32 %v2061_v50, %v2054_v49 }
 0x9d0   : > { %v2063_v53 = vpack.c.bf16 %v2062_v51, %v2062_v51 }
 0x9d2   : > { %2625 = vmatmul.mubr.bf16.vlgmr.msra.gmra.mrb[20].mxu1 %v2063_v53 }
 0xaa2   : > { %2173 = sbr.rel (%p2469_p7) target bundleno = 2729 (0xaa9), region = 84 }
 0xaa5   : > { %v2162_v55 = vpop.f32.mrb[20].mxu1 }
 0xaa6   : > { %v2168_v9 = vadd.f32 %v2162_v55, %v3458_v10  ;;  %v2626_v56 = vpop.f32.mrb[21].mxu1 }
 0xaa7   : > { %v2165_v57 = vpop.f32.mrb[22].mxu1 }
 0xaa8   : > { %2169 = vst.msk [vmem:[#allocation2] sm:$0xff] %vm666_vm1, %v2168_v9  ;;  %v2627_v58 = vpop.f32.mrb[23].mxu1  ;;  %2174 = vst.msk [vmem:[%s611_s16] sm:$0xff] (!%p2469_p7), %vm666_vm1, %v2168_v9 }
 0xaa9 PF: > { %s3620_s30 = sld [smem:[#allocation23_spill]]  ;;  %s3621_s1 = sld [smem:[#allocation20_spill]] }
 0xaaa   : > { %s2471_s18 = sshll.u32 %s2911_s25, 7  ;;  %s3622_s21 = sld [smem:[#allocation28_spill]] }
 0xaab   : > { %s2189_s27 = sshll.u32 %s611_s16, 4  ;;  %s2937_s19 = smov [#allocation8]   ;;  %s2190_s27 = int_to_ptr.vmem [resolvable:$true] %s2189_s27 }
 0xaac   : > { %s2821_s0 = scalar_lea.vmem %s2190_s27, 128  ;;  %s2825_s29 = sshll.u32 %s2937_s19, 4  ;;  %s2826_s29 = int_to_ptr.vmem [resolvable:$false] %s2825_s29 }
 0xaad   : > { %p2822_p3 = scmp.ne.s32.totalorder %s2190_s27, %s2821_s0  ;;  %s2827_s26 = scalar_lea.vmem %s2826_s29, 256 }
 0xaae   : > { %p2828_p2 = scmp.lt.s32.totalorder %s2190_s27, %s2826_s29  ;;  %p2829_p10 = scmp.lt.s32.totalorder %s2827_s26, %s2821_s0 }
 0xaaf   : > { %s2176_s24 = scalar_lea.sflag [#allocation5], %s3620_s30  ;;  %p3624_p8 = scmp.ne.s32.totalorder %s3621_s1, 0 }
 0xab0   : > { %s3623_s17 = smov %s3622_s21  ;;  %s3503_s28 = scalar_lea.hbm %s3622_s21, %s2471_s18 }
 0xab1   : > { %p2823_p12 = pnand %p2822_p3, %p3624_p8  ;;  %p2830_p11 = por %p2829_p10, %p2828_p2 }
 0xab3   : > { %p2824_p1 = pneg %p2823_p12 }
 0xab5   : > { %p2831_p4 = pnand %p2830_p11, %p2824_p1 }
 0xab7   : > { %2834 = shalt.err (!%p2831_p4)
}
 0xab8   : > { %s2835_s25 = scalar_lea.hbm %s3503_s28, 128  ;;  %s2839_s23 = scalar_lea.hbm %s3623_s17, 256 }
 0xab9   : > { %p2836_p6 = scmp.ne.s32.totalorder %s3503_s28, %s2835_s25  ;;  %p2840_p0 = scmp.lt.u32.totalorder %s3503_s28, %s3623_s17 }
 0xaba   : > { %p2841_p5 = scmp.lt.u32.totalorder %s2839_s23, %s2835_s25  ;;  %p2843_p3 = scmp.lt.u32.totalorder %s2835_s25, %s3503_s28 }
 0xabb   : > { %p2837_p13 = pnand %p2836_p6, %p3624_p8 }
 0xabc   : > { %p2842_p7 = por %p2841_p5, %p2840_p0 }
 0xabd   : > { %p2838_p9 = pneg %p2837_p13 }
 0xabe   : > { %p2844_p12 = por %p2843_p3, %p2842_p7 }
 0xac0   : > { %p2845_p1 = pnand %p2844_p12, %p2838_p9 }
 0xac2   : > { %2848 = shalt.err (!%p2845_p1)
}
 0xac3   : > { %2632 = dma.vmem_to_hbm [thread:$0]  (%p3624_p8), %s2190_s27, 128, %s3503_s28, %s2176_s24  }
 0xac4 PF: > { %s3625_s4 = sld [smem:[#allocation17_spill]]  ;;  %s3626_s13 = sld [smem:[#allocation12_spill]] }
 0xac5   : > { %s3627_s5 = sld [smem:[#allocation21_spill]] }
 0xaca   : > { %p2646_p2 = scmp.ge.s32.totalorder %s3625_s4, 2  ;;  %s2201_s30 = sand.u32 1, %s3626_s13  }
 0xacb   : > { %p3628_p10 = scmp.ne.s32.totalorder %s3627_s5, 0  ;;  %s2202_s18 = scalar_lea.sflag [#allocation5], %s2201_s30 }
 0xacd   : > { %p2642_p11 = pnand %p2646_p2, %p3628_p10 }
 0xacf   : > { %2890 = dma.done.wait (!%p2642_p11), %s2202_s18, 128  }
 0xad0   : > { %2892 = vsyncadd (!%p2642_p11), %s2202_s18, 4294967168  ;;  %s31_s28 = sadd.s32 1, %s3625_s4   ;;  %s3629_s21 = sld [smem:[#allocation13_spill]] }
 0xad1   : > { %p28_p4 = scmp.ge.s32.totalorder %s31_s28, 6   ;;  %s3630_s22 = sld [smem:[#allocation14_spill]] }
 0xad2   : > { %s3631_s23 = sld [smem:[#allocation22_spill]]  ;;  %s3632_s24 = sld [smem:[#allocation15_spill]] }
 0xad3   : > { %s3633_s25 = sld [smem:[#allocation16_spill]]  ;;  %s3634_s26 = sld [smem:[#allocation18_spill]] }
 0xad4   : > { %s3635_s27 = sld [smem:[#allocation19_spill]]  ;;  %30 = sbr.rel (!%p28_p4) target bundleno = 15 (0xf), region = 164 }
 0xadb   :  { %2207 = vsyncpa [#allocation4], 1 }
 0xadc   :  { %2209 = vsyncpa [#allocation4 + $0x1], 1 }
 0xadd   :  { %2210 = vsyncpa [#allocation7], 1 }
 0xade   :  { %2212 = vsyncpa [#allocation7 + $0x1], 1 }
 0xadf   :  { %2213 = vsyncpa [#allocation5], 1 }
 0xae0   :  { %2215 = vsyncpa [#allocation5 + $0x1], 1 }

</bundles_post_ra>
